<compile_context>
chip_gen: v5e
topology: v5e:2x2
jax: 0.10.0
libtpu: 0.0.40
codegen_flags: <defaults>
</compile_context>

<pallas_src>
from functools import partial

import jax
import jax.numpy as jnp
import numpy as np
from jax.experimental import pallas as pl
from jax.experimental.pallas import tpu as pltpu


def _linear_attention_kernel(x_ref, wqkv_ref, wout_ref, mask_ref, bg_ref, o_ref,
                             *, heads, dim_head, images_per_step, bf16_exp):
    # x_ref:   (ips, c, n)  x dtype (f32 or bf16)
    # wqkv_ref:(3H, c) bf16   wout_ref:(c, H) bf16
    # mask_ref:(H, H)  f32  block-diagonal, scale/(h*w) folded in
    # bg_ref:  (c, 2)  f32  [:,0]=b_out, [:,1]=LayerNorm gain
    # o_ref:   (ips, c, n)  out dtype
    hidden = heads * dim_head
    n = x_ref.shape[-1]

    wqkv = wqkv_ref[...]
    wout = wout_ref[...]
    mask = mask_ref[...]
    bout = bg_ref[:, 0:1]          # (c, 1)
    gain = bg_ref[:, 1:2]          # (c, 1)

    for i in range(images_per_step):
        # to_qkv 1x1 conv: (3H, c) @ (c, n) -> (3H, n); bf16 MXU, f32 accumulate.
        xb = x_ref[i].astype(jnp.bfloat16)                                    # (c, n)
        qkv = jnp.dot(wqkv, xb, preferred_element_type=jnp.float32)          # (3H, n)
        q = qkv[:hidden]                 # (H, n), row index = head*dim_head + d
        k = qkv[hidden:2 * hidden]       # (H, n)
        v = qkv[2 * hidden:]             # (H, n)

        # q.softmax(dim=-2): per-head softmax over dim_head.  The
        # (H,n)<->(heads,dim_head,n) reshape is a free view for f32
        # (dim_head=32 is a multiple of the 8-row sublane tile).
        q3 = q.reshape(heads, dim_head, n)
        qmax = jnp.max(q3, axis=1, keepdims=True)
        if bf16_exp:   # v6e/v7x bf16 EUP; keep sums/reciprocal in f32
            qe = jnp.exp((q3 - qmax).astype(jnp.bfloat16)).astype(jnp.float32)
        else:
            qe = jnp.exp(q3 - qmax)
        q = (qe * pl.reciprocal(jnp.sum(qe, axis=1, keepdims=True), approx=True)
             ).reshape(hidden, n)

        # k.softmax(dim=-1): softmax over spatial (lane axis), full 128-row width.
        kmax = jnp.max(k, axis=1, keepdims=True)
        if bf16_exp:
            ke = jnp.exp((k - kmax).astype(jnp.bfloat16)).astype(jnp.float32)
        else:
            ke = jnp.exp(k - kmax)
        k = ke * pl.reciprocal(jnp.sum(ke, axis=1, keepdims=True), approx=True)

        qb = q.astype(jnp.bfloat16)
        kb = k.astype(jnp.bfloat16)
        vb = v.astype(jnp.bfloat16)

        # Context for all heads at once: ctx_t[e, d] = sum_n v[e, n] * k[d, n].
        # One packed (H,n)x(H,n)->(H,H) MXU matmul; the precomputed constant
        # mask keeps only within-head 32x32 blocks and carries scale/(h*w).
        ctx_t = jax.lax.dot_general(vb, kb, (((1,), (1,)), ((), ())),
                                    preferred_element_type=jnp.float32)      # (H, H)
        ctx_t = (ctx_t * mask).astype(jnp.bfloat16)

        # out[e, n] = sum_d ctx_t[e, d] * q[d, n]: lane-dense n output, rows
        # already in '(h c)' channel order.
        out = jnp.dot(ctx_t, qb, preferred_element_type=jnp.float32)         # (H, n)

        # to_out 1x1 conv: y[c, n] = W_out(c, H) @ out(H, n) + b_out.
        y = jnp.dot(wout, out.astype(jnp.bfloat16),
                    preferred_element_type=jnp.float32) + bout               # (c, n)

        # LayerNorm over channels (sublane axis); internal math is f32 so the
        # f32 eps=1e-5 of the reference module is kept regardless of I/O dtype.
        mean = jnp.mean(y, axis=0, keepdims=True)
        var = jnp.mean((y - mean) ** 2, axis=0, keepdims=True)
        o_ref[i] = ((y - mean) * jax.lax.rsqrt(var + 1e-5) * gain
                    ).astype(o_ref.dtype)


def _vmem_limit_bytes(ips, c, n, hidden, x_bytes, out_bytes):
    # Per-grid-step footprint estimate (double-buffered I/O blocks + weights +
    # f32/bf16 temporaries), with headroom.  Raised above the 16/32 MiB scoped
    # defaults on v5e/v6e; capped below physical VMEM (64 MiB on v7x).
    per_step = (
        2 * ips * c * n * x_bytes            # x double-buffer
        + 2 * ips * c * n * out_bytes        # out double-buffer
        + (3 * hidden * c + c * hidden) * 2  # bf16 weights
        + hidden * hidden * 4 + c * 2 * 4    # mask + fused bias/gain
        + 3 * hidden * n * 4                 # qkv f32
        + 3 * hidden * n * 2                 # q/k/v bf16 copies
        + (hidden * n + c * n) * 4 * 2       # out / y temporaries (headroom)
    )
    limit = max(32 * 1024 * 1024, int(per_step * 1.5))
    try:
        cap = pltpu.get_tpu_info().vmem_capacity_bytes
    except Exception:
        cap = 64 * 1024 * 1024
    return min(limit, int(cap * 0.9), 128 * 1024 * 1024)


def linear_attention(x_nchw, w_qkv, w_out, b_out, g, *, heads, dim_head,
                     images_per_step=1, out_dtype=None, bf16_exp=False):
    b, c, h, w = x_nchw.shape
    n = h * w
    hidden = heads * dim_head
    scale = dim_head ** -0.5

    if out_dtype is None:
        out_dtype = x_nchw.dtype
    if b % images_per_step != 0:
        images_per_step = 1
    ips = images_per_step

    # NCHW -> (b, c, n): pure reshape (no HBM transpose passes).  Input dtype
    # is kept as-is: pass bf16 to halve HBM traffic on this bandwidth-bound op.
    x = x_nchw.reshape(b, c, n)

    # Weights pre-arranged for the channels-major layout; bf16 for the MXU.
    wqkv_t = jnp.asarray(w_qkv).T.astype(jnp.bfloat16)                 # (3H, c)
    wout_t = jnp.asarray(w_out).T.astype(jnp.bfloat16)                 # (c, H)
    bg = jnp.concatenate(
        [jnp.asarray(b_out).reshape(c, 1), jnp.asarray(g).reshape(c, 1)],
        axis=1).astype(jnp.float32)                                    # (c, 2)

    # Precomputed constant block-diagonal mask with scale/(h*w) folded in.
    mask_np = np.zeros((hidden, hidden), dtype=np.float32)
    for hh in range(heads):
        s = hh * dim_head
        mask_np[s:s + dim_head, s:s + dim_head] = scale / n
    mask = jnp.asarray(mask_np)

    kernel = partial(_linear_attention_kernel, heads=heads, dim_head=dim_head,
                     images_per_step=ips, bf16_exp=bf16_exp)

    x_bytes = jnp.dtype(x.dtype).itemsize
    o_bytes = jnp.dtype(out_dtype).itemsize
    flops_per_img = 2 * n * (3 * hidden * c + 2 * hidden * hidden + hidden * c)
    cost = pl.CostEstimate(
        flops=b * flops_per_img,
        transcendentals=b * 2 * hidden * n,
        bytes_accessed=(b * c * n * (x_bytes + o_bytes)
                        + (3 * hidden * c + c * hidden) * 2
                        + hidden * hidden * 4 + c * 2 * 4))

    # grid marked parallel (megacore / dual-TC sharding when it has >= 2 steps).
    # TODO(synk): for very large n (>~4k at c=256 on v7x's 64 MiB VMEM) add an
    # "arbitrary" n-tiling axis: pass 1 accumulates the per-head context with
    # running k-softmax max/sum in VMEM scratch, pass 2 recomputes q per n-tile
    # and emits the to_out + LayerNorm result per tile.
    out = pl.pallas_call(
        kernel,
        out_shape=jax.ShapeDtypeStruct((b, c, n), out_dtype),
        grid=(b // ips,),
        in_specs=[
            pl.BlockSpec((ips, c, n), lambda i: (i, 0, 0)),
            pl.BlockSpec((3 * hidden, c), lambda i: (0, 0)),
            pl.BlockSpec((c, hidden), lambda i: (0, 0)),
            pl.BlockSpec((hidden, hidden), lambda i: (0, 0)),
            pl.BlockSpec((c, 2), lambda i: (0, 0)),
        ],
        out_specs=pl.BlockSpec((ips, c, n), lambda i: (i, 0, 0)),
        compiler_params=pltpu.CompilerParams(
            dimension_semantics=("parallel",),
            vmem_limit_bytes=_vmem_limit_bytes(ips, c, n, hidden,
                                               x_bytes, o_bytes)),
        cost_estimate=cost,
    )(x, wqkv_t, wout_t, mask, bg)

    # (b, c, n) -> NCHW: pure reshape.
    return out.reshape(b, c, h, w)


def _reference(x_nchw, w_qkv, w_out, b_out, g, *, heads, dim_head):
    # Pure-JAX f32 reference mirroring the PyTorch module.
    b, c, h, w = x_nchw.shape
    n = h * w
    hidden = heads * dim_head
    scale = dim_head ** -0.5

    x = jnp.transpose(x_nchw.reshape(b, c, n), (0, 2, 1))          # (b, n, c)
    qkv = jnp.einsum('bnc,cd->bnd', x, w_qkv)                      # (b, n, 3H)
    q, k, v = jnp.split(qkv, 3, axis=-1)

    def to_heads(t):  # (b, n, H) -> (b, heads, d, n)
        return jnp.transpose(t.reshape(b, n, heads, dim_head), (0, 2, 3, 1))

    q, k, v = map(to_heads, (q, k, v))
    q = jax.nn.softmax(q, axis=-2) * scale
    k = jax.nn.softmax(k, axis=-1)
    v = v / n
    ctx = jnp.einsum('bhdn,bhen->bhde', k, v)
    out = jnp.einsum('bhde,bhdn->bhen', ctx, q)                    # (b, h, e, n)
    out = jnp.transpose(out, (0, 3, 1, 2)).reshape(b, n, hidden)   # (b, n, H)
    y = jnp.einsum('bnh,hc->bnc', out, w_out) + b_out              # (b, n, c)
    mean = jnp.mean(y, axis=-1, keepdims=True)
    var = jnp.mean((y - mean) ** 2, axis=-1, keepdims=True)
    y = (y - mean) * jax.lax.rsqrt(var + 1e-5) * g
    return jnp.transpose(y, (0, 2, 1)).reshape(b, c, h, w)


if __name__ == "__main__":
    # Small shapes consistent with the module defaults (heads=4, dim_head=32).
    B, DIM, H, W = 4, 8, 16, 16
    HEADS, DIM_HEAD = 4, 32
    HIDDEN = HEADS * DIM_HEAD

    key = jax.random.PRNGKey(0)
    kx, kw1, kw2, kb = jax.random.split(key, 4)

    x = jax.random.normal(kx, (B, DIM, H, W), dtype=jnp.float32)
    w_qkv = jax.random.normal(kw1, (DIM, 3 * HIDDEN), dtype=jnp.float32) * 0.05
    w_out = jax.random.normal(kw2, (HIDDEN, DIM), dtype=jnp.float32) * 0.05
    b_out = jax.random.normal(kb, (1, DIM), dtype=jnp.float32) * 0.05
    g = jnp.ones((1, DIM), dtype=jnp.float32)   # LayerNorm gain

    ref = _reference(x, w_qkv, w_out, b_out, g, heads=HEADS, dim_head=DIM_HEAD)

    # 1) f32 boundary path (tight algorithmic check; bf16 MXU inputs inside).
    out_f32 = linear_attention(x, w_qkv, w_out, b_out, g,
                               heads=HEADS, dim_head=DIM_HEAD,
                               images_per_step=1)
    out_f32 = jax.block_until_ready(out_f32)
    np.testing.assert_allclose(np.asarray(out_f32), np.asarray(ref),
                               rtol=1e-2, atol=1e-2)

    # 2) bf16 boundary path (halved HBM traffic) + 2 images per grid step
    #    (grid still has 2 parallel steps -> both v7x TensorCores used).
    out_bf16 = linear_attention(x.astype(jnp.bfloat16), w_qkv, w_out, b_out, g,
                                heads=HEADS, dim_head=DIM_HEAD,
                                images_per_step=2)
    out_bf16 = jax.block_until_ready(out_bf16)
    np.testing.assert_allclose(np.asarray(out_bf16.astype(jnp.float32)),
                               np.asarray(ref), rtol=5e-2, atol=5e-2)

    print("KERNEL_OK")
</pallas_src>

<mosaic_0001>
module attributes {stable_mosaic.version = 11 : i64} {
  func.func @_linear_attention_kernel(%arg0: i32, %arg1: memref<1x8x256xf32, #tpu.memory_space<vmem>>, %arg2: memref<384x8xbf16, #tpu.memory_space<vmem>>, %arg3: memref<8x128xbf16, #tpu.memory_space<vmem>>, %arg4: memref<128x128xf32, #tpu.memory_space<vmem>>, %arg5: memref<8x2xf32, #tpu.memory_space<vmem>>, %arg6: memref<1x8x256xf32, #tpu.memory_space<vmem>>) attributes {dimension_semantics = [#tpu.dimension_semantics<parallel>], iteration_bounds = array<i64: 4>, scalar_prefetch = 0 : i64, scratch_operands = 0 : i64, tpu.core_type = #tpu.core_type<tc>, window_params = [{transform_indices = @transform_0, window_bounds = array<i64: 1, 8, 256>}, {pipeline_mode = #tpu.pipeline_mode<synchronous>, transform_indices = @transform_1, window_bounds = array<i64: 384, 8>}, {pipeline_mode = #tpu.pipeline_mode<synchronous>, transform_indices = @transform_2, window_bounds = array<i64: 8, 128>}, {pipeline_mode = #tpu.pipeline_mode<synchronous>, transform_indices = @transform_3, window_bounds = array<i64: 128, 128>}, {pipeline_mode = #tpu.pipeline_mode<synchronous>, transform_indices = @transform_4, window_bounds = array<i64: 8, 2>}, {transform_indices = @transform_5, window_bounds = array<i64: 1, 8, 256>}]} {
    %c0 = arith.constant 0 : index
    %c0_0 = arith.constant 0 : index
    %0 = vector.load %arg2[%c0, %c0_0] : memref<384x8xbf16, #tpu.memory_space<vmem>>, vector<384x8xbf16>
    %c0_1 = arith.constant 0 : index
    %c0_2 = arith.constant 0 : index
    %1 = vector.load %arg3[%c0_1, %c0_2] : memref<8x128xbf16, #tpu.memory_space<vmem>>, vector<8x128xbf16>
    %c0_3 = arith.constant 0 : index
    %c0_4 = arith.constant 0 : index
    %2 = vector.load %arg4[%c0_3, %c0_4] : memref<128x128xf32, #tpu.memory_space<vmem>>, vector<128x128xf32>
    %c0_5 = arith.constant 0 : index
    %c0_6 = arith.constant 0 : index
    %3 = vector.load %arg5[%c0_5, %c0_6] : memref<8x2xf32, #tpu.memory_space<vmem>>, vector<8x1xf32>
    %c0_7 = arith.constant 0 : index
    %c1 = arith.constant 1 : index
    %4 = vector.load %arg5[%c0_7, %c1] : memref<8x2xf32, #tpu.memory_space<vmem>>, vector<8x1xf32>
    %c0_8 = arith.constant 0 : index
    %c0_9 = arith.constant 0 : index
    %c0_10 = arith.constant 0 : index
    %5 = vector.load %arg1[%c0_8, %c0_9, %c0_10] : memref<1x8x256xf32, #tpu.memory_space<vmem>>, vector<1x8x256xf32>
    %6 = vector.shape_cast %5 : vector<1x8x256xf32> to vector<8x256xf32>
    %7 = arith.truncf %6 : vector<8x256xf32> to vector<8x256xbf16>
    %cst = arith.constant dense<0.000000e+00> : vector<384x256xf32>
    %8 = tpu.matmul %0, %7, %cst {dimension_numbers = #tpu.dot_dimension_numbers<[1], [0], [0], [1], [0, 0, 1, 1], [], []>} : vector<384x8xbf16>, vector<8x256xbf16>, vector<384x256xf32> -> vector<384x256xf32>
    %9 = vector.extract_strided_slice %8 {offsets = [0, 0], sizes = [128, 256], strides = [1, 1]} : vector<384x256xf32> to vector<128x256xf32>
    %10 = vector.extract_strided_slice %8 {offsets = [128, 0], sizes = [128, 256], strides = [1, 1]} : vector<384x256xf32> to vector<128x256xf32>
    %11 = vector.extract_strided_slice %8 {offsets = [256, 0], sizes = [128, 256], strides = [1, 1]} : vector<384x256xf32> to vector<128x256xf32>
    %12 = vector.shape_cast %9 : vector<128x256xf32> to vector<4x32x256xf32>
    %cst_11 = arith.constant dense<0xFF800000> : vector<4x256xf32>
    %13 = vector.multi_reduction <maximumf>, %12, %cst_11 [1] : vector<4x32x256xf32> to vector<4x256xf32>
    %14 = vector.shape_cast %13 : vector<4x256xf32> to vector<4x1x256xf32>
    %15 = vector.broadcast %14 : vector<4x1x256xf32> to vector<4x32x256xf32>
    %16 = arith.subf %12, %15 : vector<4x32x256xf32>
    %17 = math.exp %16 : vector<4x32x256xf32>
    %cst_12 = arith.constant dense<0.000000e+00> : vector<4x256xf32>
    %18 = vector.multi_reduction <add>, %17, %cst_12 [1] : vector<4x32x256xf32> to vector<4x256xf32>
    %19 = vector.shape_cast %18 : vector<4x256xf32> to vector<4x1x256xf32>
    %20 = tpu.reciprocal %19 {approx = true} : vector<4x1x256xf32> -> vector<4x1x256xf32>
    %21 = vector.broadcast %20 : vector<4x1x256xf32> to vector<4x32x256xf32>
    %22 = arith.mulf %17, %21 : vector<4x32x256xf32>
    %23 = vector.shape_cast %22 : vector<4x32x256xf32> to vector<128x256xf32>
    %cst_13 = arith.constant dense<0xFF800000> : vector<128xf32>
    %24 = vector.multi_reduction <maximumf>, %10, %cst_13 [1] : vector<128x256xf32> to vector<128xf32>
    %25 = vector.shape_cast %24 : vector<128xf32> to vector<128x1xf32>
    %26 = vector.broadcast %25 : vector<128x1xf32> to vector<128x256xf32>
    %27 = arith.subf %10, %26 : vector<128x256xf32>
    %28 = math.exp %27 : vector<128x256xf32>
    %cst_14 = arith.constant dense<0.000000e+00> : vector<128xf32>
    %29 = vector.multi_reduction <add>, %28, %cst_14 [1] : vector<128x256xf32> to vector<128xf32>
    %30 = vector.shape_cast %29 : vector<128xf32> to vector<128x1xf32>
    %31 = tpu.reciprocal %30 {approx = true} : vector<128x1xf32> -> vector<128x1xf32>
    %32 = vector.broadcast %31 : vector<128x1xf32> to vector<128x256xf32>
    %33 = arith.mulf %28, %32 : vector<128x256xf32>
    %34 = arith.truncf %23 : vector<128x256xf32> to vector<128x256xbf16>
    %35 = arith.truncf %33 : vector<128x256xf32> to vector<128x256xbf16>
    %36 = arith.truncf %11 : vector<128x256xf32> to vector<128x256xbf16>
    %cst_15 = arith.constant dense<0.000000e+00> : vector<128x128xf32>
    %37 = tpu.matmul %36, %35, %cst_15 {dimension_numbers = #tpu.dot_dimension_numbers<[1], [1], [0], [0], [0, 0, 1, 0], [], []>} : vector<128x256xbf16>, vector<128x256xbf16>, vector<128x128xf32> -> vector<128x128xf32>
    %38 = arith.mulf %37, %2 : vector<128x128xf32>
    %39 = arith.truncf %38 : vector<128x128xf32> to vector<128x128xbf16>
    %cst_16 = arith.constant dense<0.000000e+00> : vector<128x256xf32>
    %40 = tpu.matmul %39, %34, %cst_16 {dimension_numbers = #tpu.dot_dimension_numbers<[1], [0], [0], [1], [0, 0, 1, 1], [], []>} : vector<128x128xbf16>, vector<128x256xbf16>, vector<128x256xf32> -> vector<128x256xf32>
    %41 = arith.truncf %40 : vector<128x256xf32> to vector<128x256xbf16>
    %cst_17 = arith.constant dense<0.000000e+00> : vector<8x256xf32>
    %42 = tpu.matmul %1, %41, %cst_17 {dimension_numbers = #tpu.dot_dimension_numbers<[1], [0], [0], [1], [0, 0, 1, 1], [], []>} : vector<8x128xbf16>, vector<128x256xbf16>, vector<8x256xf32> -> vector<8x256xf32>
    %43 = vector.broadcast %3 : vector<8x1xf32> to vector<8x256xf32>
    %44 = arith.addf %42, %43 : vector<8x256xf32>
    %cst_18 = arith.constant dense<0.000000e+00> : vector<256xf32>
    %45 = vector.multi_reduction <add>, %44, %cst_18 [0] : vector<8x256xf32> to vector<256xf32>
    %46 = vector.shape_cast %45 : vector<256xf32> to vector<1x256xf32>
    %cst_19 = arith.constant 8.000000e+00 : f32
    %47 = vector.broadcast %cst_19 : f32 to vector<1x256xf32>
    %48 = arith.divf %46, %47 : vector<1x256xf32>
    %49 = vector.broadcast %48 : vector<1x256xf32> to vector<8x256xf32>
    %50 = arith.subf %44, %49 : vector<8x256xf32>
    %51 = arith.mulf %50, %50 : vector<8x256xf32>
    %cst_20 = arith.constant dense<0.000000e+00> : vector<256xf32>
    %52 = vector.multi_reduction <add>, %51, %cst_20 [0] : vector<8x256xf32> to vector<256xf32>
    %53 = vector.shape_cast %52 : vector<256xf32> to vector<1x256xf32>
    %cst_21 = arith.constant 8.000000e+00 : f32
    %54 = vector.broadcast %cst_21 : f32 to vector<1x256xf32>
    %55 = arith.divf %53, %54 : vector<1x256xf32>
    %56 = vector.broadcast %48 : vector<1x256xf32> to vector<8x256xf32>
    %57 = arith.subf %44, %56 : vector<8x256xf32>
    %cst_22 = arith.constant 9.99999974E-6 : f32
    %58 = vector.broadcast %cst_22 : f32 to vector<1x256xf32>
    %59 = arith.addf %55, %58 : vector<1x256xf32>
    %60 = math.rsqrt %59 : vector<1x256xf32>
    %61 = vector.broadcast %60 : vector<1x256xf32> to vector<8x256xf32>
    %62 = arith.mulf %57, %61 : vector<8x256xf32>
    %63 = vector.broadcast %4 : vector<8x1xf32> to vector<8x256xf32>
    %64 = arith.mulf %62, %63 : vector<8x256xf32>
    %c0_23 = arith.constant 0 : index
    %c0_24 = arith.constant 0 : index
    %c0_25 = arith.constant 0 : index
    %65 = vector.load %arg6[%c0_23, %c0_24, %c0_25] : memref<1x8x256xf32, #tpu.memory_space<vmem>>, vector<1x8x256xf32>
    %66 = vector.shape_cast %65 : vector<1x8x256xf32> to vector<8x256xf32>
    %67 = vector.shape_cast %64 : vector<8x256xf32> to vector<1x8x256xf32>
    tpu.vector_store %arg6[%c0_23, %c0_24, %c0_25], %67 {strides = array<i32>} : memref<1x8x256xf32, #tpu.memory_space<vmem>>, vector<1x8x256xf32>,
    return
  }
  func.func @transform_0(%arg0: i32) -> (i32, i32, i32) {
    %c0_i32 = arith.constant 0 : i32
    %c0_i32_0 = arith.constant 0 : i32
    %c0_i32_1 = arith.constant 0 : i32
    return %arg0, %c0_i32, %c0_i32_0 : i32, i32, i32
  }
  func.func @transform_1(%arg0: i32) -> (i32, i32) {
    %c0_i32 = arith.constant 0 : i32
    %c0_i32_0 = arith.constant 0 : i32
    %c0_i32_1 = arith.constant 0 : i32
    return %c0_i32, %c0_i32_0 : i32, i32
  }
  func.func @transform_2(%arg0: i32) -> (i32, i32) {
    %c0_i32 = arith.constant 0 : i32
    %c0_i32_0 = arith.constant 0 : i32
    %c0_i32_1 = arith.constant 0 : i32
    return %c0_i32, %c0_i32_0 : i32, i32
  }
  func.func @transform_3(%arg0: i32) -> (i32, i32) {
    %c0_i32 = arith.constant 0 : i32
    %c0_i32_0 = arith.constant 0 : i32
    %c0_i32_1 = arith.constant 0 : i32
    return %c0_i32, %c0_i32_0 : i32, i32
  }
  func.func @transform_4(%arg0: i32) -> (i32, i32) {
    %c0_i32 = arith.constant 0 : i32
    %c0_i32_0 = arith.constant 0 : i32
    %c0_i32_1 = arith.constant 0 : i32
    return %c0_i32, %c0_i32_0 : i32, i32
  }
  func.func @transform_5(%arg0: i32) -> (i32, i32, i32) {
    %c0_i32 = arith.constant 0 : i32
    %c0_i32_0 = arith.constant 0 : i32
    %c0_i32_1 = arith.constant 0 : i32
    return %arg0, %c0_i32, %c0_i32_0 : i32, i32, i32
  }
}

</mosaic_0001>

<bundles_post_ra>
// kernel: tpu_custom_call.1
= control target key start
LH: loop header
LB: loop body
LE: loop exit
PB: predicated region body
PF: predicated region fallthrough
CT: control target
= control target key end

     0   :  { %10 = vsyncpa [#allocation3], 0  ;;  %s3076_s0 = inlined_call_operand.vmem [shape: f32[4,8,256], index: 0, kind: input, shape index: {}]   ;;  %s3077_s1 = inlined_call_operand.vmem [shape: bf16[384,8], index: 1, kind: input, shape index: {}]   ;;  %s3078_s2 = inlined_call_operand.vmem [shape: bf16[8,128], index: 2, kind: input, shape index: {}]   ;;  %s3079_s3 = inlined_call_operand.vmem [shape: f32[128,128], index: 3, kind: input, shape index: {}]   ;;  %s3080_s4 = inlined_call_operand.vmem [shape: f32[8,2], index: 4, kind: input, shape index: {}]   ;;  %s3081_s5 = inlined_call_operand.hbm [shape: f32[4,8,256], index: 5, kind: output, shape index: {}]  }
   0x1   :  { %12 = vsyncpa [#allocation3 + $0x1], 0  ;;  %s2239_s18 = smov 0   ;;  %s2241_s19 = smov 0  }
   0x2   :  { %s2243_s20 = smov 0   ;;  %s2245_s21 = smov 0  }
   0x3 LB: > { %s2260_s22 = sadd.s32 4294967295, %s2204_s21   ;;  %s1734_s23 = sadd.s32 4294967294, %s2204_s21   ;;  %s2204_s21 = sphi %s2245_s21, %s3148_s21   ;;  %s2200_s20 = sphi %s2243_s20, %s3147_s20   ;;  %s2196_s19 = sphi %s2241_s19, %s3146_s19   ;;  %s2192_s18 = sphi %s2239_s18, %s3145_s18  }
   0x4   : > { %s2264_s24 = sadd.s32 1, %s2204_s21   ;;  %s135_s25 = sadd.s32 1, %s2200_s20 }
   0x5   : > { %s132_s26 = ssub.s32 %s2204_s21, %s2264_s24  ;;  %p145_p0 = scmp.ne.s32.totalorder %s2200_s20, %s2196_s19 }
   0x6   : > { %p133_p1 = scmp.eq.s32.totalorder %s132_s26, 0  ;;  %p146_p2 = scmp.eq.s32.totalorder %s2260_s22, 3 }
   0x7   : > { %p151_p3 = scmp.ne.s32.totalorder %s2196_s19, %s2192_s18  ;;  %p152_p4 = scmp.eq.s32.totalorder %s1734_s23, 3 }
   0x8   : > { %s2275_s27 = scalar_select %p133_p1, %s2200_s20, %s135_s25  }
   0x9   : > { %p2277_p5 = por %p146_p2, %p145_p0  ;;  %p2281_p6 = por %p152_p4, %p151_p3 }
   0xa   : > { %p1737_p7 = scmp.ge.s32.totalorder %s2204_s21, 1  ;;  %p190_p8 = scmp.lt.s32.totalorder %s2204_s21, 5 }
   0xc   : > { %p191_p9 = pnand %p1737_p7, %p190_p8 }
   0xe   : > { %194 = sbr.rel (%p191_p9) target bundleno = 1428 (0x594), region = 40 }
  0x13   : > { %p218_p10 = scmp.lt.s32.totalorder %s2260_s22, 3  ;;  %vm487_vm0 = vcmask 1043456   ;;  %v1891_v6 = vld [vmem:[%s3077_s1] sm:$0xff]  ;;  %vm414_vm1 = vcmask 64512   ;;  %v1892_v7 = vld [vmem:[%s3077_s1 + $0x8] sm:$0xff]  ;;  %v1893_v8 = vld [vmem:[%s3077_s1 + $0x10] sm:$0xff] }
  0x14   : > { %v1894_v9 = vld [vmem:[%s3077_s1 + $0x18] sm:$0xff]  ;;  %v1895_v10 = vld [vmem:[%s3077_s1 + $0x20] sm:$0xff]  ;;  %v1896_v11 = vld [vmem:[%s3077_s1 + $0x28] sm:$0xff]  ;;  %s215_s14 = sand.u32 1, %s2196_s19   ;;  %s1915_s16 = sshll.u32 %s2260_s22, 4 }
  0x15   : > { %s219_s30 = scalar_select %p218_p10, %s2260_s22, 3  ;;  %v1897_v12 = vld [vmem:[%s3077_s1 + $0x30] sm:$0xff]  ;;  %v1898_v13 = vld [vmem:[%s3077_s1 + $0x38] sm:$0xff]  ;;  %v1899_v14 = vld [vmem:[%s3077_s1 + $0x40] sm:$0xff] }
  0x16   : > { %v1900_v21 = vld [vmem:[%s3077_s1 + $0x48] sm:$0xff]  ;;  %v1901_v36 = vld [vmem:[%s3077_s1 + $0x50] sm:$0xff]  ;;  %s1738_s15 = sshll.u32 %s215_s14, 4  ;;  %s1670_s25 = scalar_lea.hbm %s3081_s5, %s1915_s16 }
  0x17   : > { %s1890_s6 = sshll.u32 %s219_s30, 4  ;;  %s217_s22 = scalar_lea.vmem [#allocation2], %s1738_s15 }
  0x18   : > { %s222_s9 = scalar_lea.vmem %s3076_s0, %s1890_s6  ;;  %s1672_s26 = sshll.u32 %s217_s22, 4  ;;  %s1673_s26 = int_to_ptr.vmem [resolvable:$true] %s1672_s26 }
  0x19   : > { %v290_v0 = vld [vmem:[%s222_s9] sm:$0xff]  ;;  %v291_v1 = vld [vmem:[%s222_s9 + $0x8] sm:$0xff]  ;;  %s1674_s30 = sshll.u32 %s1670_s25, 4  ;;  %s1659_s6 = scalar_lea.sflag [#allocation3], %s215_s14  ;;  %s1675_s30 = int_to_ptr.hbm [resolvable:$true] %s1674_s30 }
  0x1a   : > { %v292_v2 = vpack.c.bf16 %v290_v0, %v290_v0  ;;  %v293_v3 = vpack.c.bf16 %v291_v1, %v291_v1  ;;  %v1902_v0 = vld [vmem:[%s3077_s1 + $0x58] sm:$0xff]  ;;  %s2156_s7 = sshra.s32 %s1675_s30, 4  ;;  %s2162_s11 = scalar_lea.hbm %s3081_s5, 64  ;;  %s2157_s7 = int_to_ptr.hbm [resolvable:$true] %s2156_s7 }
  0x1b   : > { %s2158_s8 = scalar_lea.hbm %s2157_s7, 16  ;;  %p2163_p0 = scmp.lt.s32.totalorder %s2157_s7, %s3081_s5 }
  0x1c   : > { %v489_v4 = vsel %vm487_vm0, %v292_v2, 0  ;;  %v492_v5 = vsel %vm487_vm0, %v293_v3, 0  ;;  %p2159_p11 = scmp.ne.s32.totalorder %s2157_s7, %s2158_s8  ;;  %p2164_p1 = scmp.lt.s32.totalorder %s2162_s11, %s2158_s8 }
  0x1d   : > { %501 = vmatpush.bf16.msra.mxu0 %v489_v4  ;;  %630 = vmatpush.bf16.msra.mxu1 %v492_v5 }
  0x1e   : > { %p2160_p12 = pnand %p2159_p11, %p2277_p5  ;;  %p2165_p2 = por %p2164_p1, %p2163_p0 }
  0x20   : > { %1837 = vmatmul.msk.bf16.vlgmr.msra.gmra.mxu0 %vm414_vm1, %v1891_v6  ;;  %1861 = vmatmul.msk.bf16.vlgmr.msra.gmra.mxu1 %vm414_vm1, %v1891_v6  ;;  %p2161_p13 = pneg %p2160_p12 }
  0x22   : > { %p2166_p3 = pnand %p2165_p2, %p2161_p13 }
  0x30   : > { %1838 = vmatmul.msk.bf16.gmra.mxu0 %vm414_vm1, %v1892_v7  ;;  %1862 = vmatmul.msk.bf16.gmra.mxu1 %vm414_vm1, %v1892_v7 }
  0x40   : > { %1839 = vmatmul.msk.bf16.gmra.mxu0 %vm414_vm1, %v1893_v8  ;;  %1863 = vmatmul.msk.bf16.gmra.mxu1 %vm414_vm1, %v1893_v8 }
  0x50   : > { %1840 = vmatmul.msk.bf16.gmra.mxu0 %vm414_vm1, %v1894_v9  ;;  %1864 = vmatmul.msk.bf16.gmra.mxu1 %vm414_vm1, %v1894_v9 }
  0x60   : > { %1841 = vmatmul.msk.bf16.gmra.mxu0 %vm414_vm1, %v1895_v10  ;;  %1865 = vmatmul.msk.bf16.gmra.mxu1 %vm414_vm1, %v1895_v10 }
  0x70   : > { %1842 = vmatmul.msk.bf16.gmra.mxu0 %vm414_vm1, %v1896_v11  ;;  %1866 = vmatmul.msk.bf16.gmra.mxu1 %vm414_vm1, %v1896_v11 }
  0x80   : > { %1843 = vmatmul.msk.bf16.gmra.mxu0 %vm414_vm1, %v1897_v12  ;;  %1867 = vmatmul.msk.bf16.gmra.mxu1 %vm414_vm1, %v1897_v12 }
  0x90   : > { %1844 = vmatmul.msk.bf16.gmra.mxu0 %vm414_vm1, %v1898_v13  ;;  %1868 = vmatmul.msk.bf16.gmra.mxu1 %vm414_vm1, %v1898_v13 }
  0x9d   : > { %v503_v15 = vpop.f32.mrf.mxu0  ;;  %v632_v16 = vpop.f32.mrf.mxu1 }
  0xa0   : > { %1845 = vmatmul.msk.bf16.gmra.mxu0 %vm414_vm1, %v1899_v14  ;;  %1869 = vmatmul.msk.bf16.gmra.mxu1 %vm414_vm1, %v1899_v14 }
  0xa5   : > { %v505_v17 = vpop.f32.mrf.mxu0  ;;  %v634_v18 = vpop.f32.mrf.mxu1 }
  0xa6   : > { %v752_v19 = vmax.f32 %v503_v15, %v505_v17  ;;  %v761_v20 = vmax.f32 %v632_v16, %v634_v18 }
  0xad   : > { %v508_v22 = vpop.f32.mrf.mxu0  ;;  %v637_v23 = vpop.f32.mrf.mxu1 }
  0xae   : > { %v753_v24 = vmax.f32 %v752_v19, %v508_v22  ;;  %v762_v25 = vmax.f32 %v761_v20, %v637_v23 }
  0xb0   : > { %1846 = vmatmul.msk.bf16.gmra.mxu0 %vm414_vm1, %v1900_v21  ;;  %1870 = vmatmul.msk.bf16.gmra.mxu1 %vm414_vm1, %v1900_v21 }
  0xb5   : > { %v510_v26 = vpop.f32.mrf.mxu0  ;;  %v639_v27 = vpop.f32.mrf.mxu1 }
  0xb6   : > { %v754_v28 = vmax.f32 %v753_v24, %v510_v26  ;;  %v763_v29 = vmax.f32 %v762_v25, %v639_v27 }
  0xb8   : > { %v755_v30 = vrot.slane %v754_v28, 4  ;;  %v764_v31 = vrot.slane %v763_v29, 4 }
  0xba   : > { %v756_v32 = vmax.f32 %v754_v28, %v755_v30  ;;  %v765_v33 = vmax.f32 %v763_v29, %v764_v31 }
  0xbc   : > { %v757_v34 = vrot.slane %v756_v32, 2  ;;  %v766_v35 = vrot.slane %v765_v33, 2 }
  0xbd   : > { %v2345_v37 = vpop.f32.mrf.mxu0  ;;  %v2347_v38 = vpop.f32.mrf.mxu1 }
  0xbe   : > { %v758_v39 = vmax.f32 %v756_v32, %v757_v34  ;;  %v767_v40 = vmax.f32 %v765_v33, %v766_v35  ;;  %v1903_v33 = vld [vmem:[%s3077_s1 + $0x60] sm:$0xff] }
  0xc0   : > { %v759_v41 = vrot.slane %v758_v39, 1  ;;  %v768_v42 = vrot.slane %v767_v40, 1  ;;  %1847 = vmatmul.msk.bf16.gmra.mxu0 %vm414_vm1, %v1901_v36  ;;  %1871 = vmatmul.msk.bf16.gmra.mxu1 %vm414_vm1, %v1901_v36 }
  0xc2   : > { %v760_v43 = vmax.f32 %v758_v39, %v759_v41  ;;  %v769_v44 = vmax.f32 %v767_v40, %v768_v42 }
  0xc4   : > { %v824_v45 = vsub.f32 %v503_v15, %v760_v43  ;;  %v826_v46 = vsub.f32 %v505_v17, %v760_v43  ;;  %v830_v47 = vsub.f32 %v510_v26, %v760_v43  ;;  %v825_v48 = vsub.f32 %v632_v16, %v769_v44 }
  0xc5   : > { %v827_v49 = vsub.f32 %v634_v18, %v769_v44  ;;  %v831_v50 = vsub.f32 %v639_v27, %v769_v44  ;;  %v2351_v51 = vpop.f32.mrf.mxu0  ;;  %v2353_v52 = vpop.f32.mrf.mxu1  ;;  %v828_v53 = vsub.f32 %v508_v22, %v760_v43  ;;  %v829_v54 = vsub.f32 %v637_v23, %v769_v44 }
  0xc6   : > { %v856_v55 = vmul.f32 1.442695, %v824_v45  ;;  %v860_v56 = vmul.f32 1.442695, %v826_v46  ;;  %v770_v57 = vmax.f32 %v2345_v37, %v2351_v51  ;;  %v858_v58 = vmul.f32 1.442695, %v825_v48 }
  0xc7   : > { %v779_v59 = vmax.f32 %v2347_v38, %v2353_v52  ;;  %v862_v60 = vmul.f32 1.442695, %v827_v49  ;;  %v864_v61 = vmul.f32 1.442695, %v828_v53  ;;  %v866_v62 = vmul.f32 1.442695, %v829_v54 }
  0xc8   : > { %1960 = vpow2.f32 %v856_v55  ;;  %v868_v63 = vmul.f32 1.442695, %v830_v47  ;;  %v870_v1 = vmul.f32 1.442695, %v831_v50 }
  0xc9   : > { %1962 = vpow2.f32 %v860_v56 }
  0xca   : > { %1964 = vpow2.f32 %v858_v58 }
  0xcb   : > { %1966 = vpow2.f32 %v862_v60 }
  0xcc   : > { %1968 = vpow2.f32 %v864_v61 }
  0xcd   : > { %v2362_v2 = vpop.f32.mrf.mxu0  ;;  %v2364_v3 = vpop.f32.mrf.mxu1  ;;  %1970 = vpow2.f32 %v866_v62 }
  0xce   : > { %v2366_v4 = vpop.eup %1960  ;;  %v771_v5 = vmax.f32 %v770_v57, %v2362_v2  ;;  %v780_v6 = vmax.f32 %v779_v59, %v2364_v3  ;;  %1972 = vpow2.f32 %v868_v63 }
  0xcf   : > { %v2370_v7 = vpop.eup %1962  ;;  %1974 = vpow2.f32 %v870_v1 }
  0xd0   : > { %1848 = vmatmul.msk.bf16.gmra.mxu0 %vm414_vm1, %v1902_v0  ;;  %1872 = vmatmul.msk.bf16.gmra.mxu1 %vm414_vm1, %v1902_v0  ;;  %v920_v8 = vadd.f32 %v2370_v7, %v2366_v4  ;;  %v2376_v9 = vpop.eup %1964 }
  0xd1   : > { %v2378_v10 = vpop.eup %1966 }
  0xd2   : > { %v929_v11 = vadd.f32 %v2378_v10, %v2376_v9  ;;  %v2382_v12 = vpop.eup %1968 }
  0xd3   : > { %v2384_v13 = vpop.eup %1970  ;;  %v921_v16 = vadd.f32 %v2382_v12, %v920_v8 }
  0xd4   : > { %v2387_v17 = vpop.eup %1972  ;;  %v930_v20 = vadd.f32 %v2384_v13, %v929_v11 }
  0xd5   : > { %v520_v14 = vpop.f32.mrf.mxu0  ;;  %v649_v15 = vpop.f32.mrf.mxu1  ;;  %v922_v22 = vadd.f32 %v2387_v17, %v921_v16 }
  0xd6   : > { %v772_v18 = vmax.f32 %v771_v5, %v520_v14  ;;  %v781_v19 = vmax.f32 %v780_v6, %v649_v15  ;;  %v2390_v21 = vpop.eup %1974  ;;  %v1904_v6 = vld [vmem:[%s3077_s1 + $0x68] sm:$0xff] }
  0xd7   : > { %v931_v25 = vadd.f32 %v2390_v21, %v930_v20  ;;  %v923_v26 = vrot.slane %v922_v22, 4 }
  0xd8   : > { %v773_v23 = vrot.slane %v772_v18, 4  ;;  %v782_v24 = vrot.slane %v781_v19, 4 }
  0xd9   : > { %v932_v29 = vrot.slane %v931_v25, 4  ;;  %v924_v30 = vadd.f32 %v923_v26, %v922_v22 }
  0xda   : > { %v774_v27 = vmax.f32 %v772_v18, %v773_v23  ;;  %v783_v28 = vmax.f32 %v781_v19, %v782_v24 }
  0xdb   : > { %v933_v34 = vadd.f32 %v932_v29, %v931_v25  ;;  %v925_v41 = vrot.slane %v924_v30, 2 }
  0xdc   : > { %v775_v31 = vrot.slane %v774_v27, 2  ;;  %v784_v32 = vrot.slane %v783_v28, 2 }
  0xdd   : > { %v2397_v35 = vpop.f32.mrf.mxu0  ;;  %v2399_v36 = vpop.f32.mrf.mxu1  ;;  %v934_v42 = vrot.slane %v933_v34, 2  ;;  %v926_v47 = vadd.f32 %v925_v41, %v924_v30 }
  0xde   : > { %v776_v39 = vmax.f32 %v774_v27, %v775_v31  ;;  %v785_v40 = vmax.f32 %v783_v28, %v784_v32 }
  0xdf   : > { %v935_v48 = vadd.f32 %v934_v42, %v933_v34  ;;  %v927_v0 = vrot.slane %v926_v47, 1 }
  0xe0   : > { %v777_v43 = vrot.slane %v776_v39, 1  ;;  %v786_v44 = vrot.slane %v785_v40, 1  ;;  %1849 = vmatmul.msk.bf16.gmra.mxu0 %vm414_vm1, %v1903_v33  ;;  %1873 = vmatmul.msk.bf16.gmra.mxu1 %vm414_vm1, %v1903_v33 }
  0xe1   : > { %v936_v1 = vrot.slane %v935_v48, 1  ;;  %v928_v8 = vadd.f32 %v927_v0, %v926_v47 }
  0xe2   : > { %v778_v45 = vmax.f32 %v776_v39, %v777_v43  ;;  %v787_v46 = vmax.f32 %v785_v40, %v786_v44 }
  0xe4   : > { %v832_v49 = vsub.f32 %v2345_v37, %v778_v45  ;;  %v834_v50 = vsub.f32 %v2351_v51, %v778_v45  ;;  %v838_v53 = vsub.f32 %v520_v14, %v778_v45  ;;  %v833_v54 = vsub.f32 %v2347_v38, %v787_v46 }
  0xe5   : > { %v835_v55 = vsub.f32 %v2353_v52, %v787_v46  ;;  %v839_v56 = vsub.f32 %v649_v15, %v787_v46  ;;  %v2407_v57 = vpop.f32.mrf.mxu0  ;;  %v2409_v58 = vpop.f32.mrf.mxu1  ;;  %v836_v59 = vsub.f32 %v2362_v2, %v778_v45  ;;  %v837_v60 = vsub.f32 %v2364_v3, %v787_v46 }
  0xe6   : > { %v872_v61 = vmul.f32 1.442695, %v832_v49  ;;  %v876_v62 = vmul.f32 1.442695, %v834_v50  ;;  %v884_v63 = vmul.f32 1.442695, %v838_v53  ;;  %v788_v2 = vmax.f32 %v2397_v35, %v2407_v57 }
  0xe7   : > { %v874_v37 = vmul.f32 1.442695, %v833_v54  ;;  %v878_v51 = vmul.f32 1.442695, %v835_v55  ;;  %v886_v38 = vmul.f32 1.442695, %v839_v56  ;;  %v797_v3 = vmax.f32 %v2399_v36, %v2409_v58 }
  0xe8   : > { %1976 = vpow2.f32 %v872_v61  ;;  %v880_v52 = vmul.f32 1.442695, %v836_v59  ;;  %v882_v5 = vmul.f32 1.442695, %v837_v60  ;;  %v937_v15 = vadd.f32 %v936_v1, %v935_v48 }
  0xe9   : > { %1978 = vpow2.f32 %v876_v62 }
  0xea   : > { %1980 = vpow2.f32 %v884_v63 }
  0xeb   : > { %1982 = vpow2.f32 %v874_v37 }
  0xec   : > { %1984 = vpow2.f32 %v878_v51 }
  0xed   : > { %1986 = vpow2.f32 %v886_v38  ;;  %v2420_v11 = vpop.f32.mrf.mxu0  ;;  %v2422_v14 = vpop.f32.mrf.mxu1 }
  0xee   : > { %v2424_v16 = vpop.eup %1976  ;;  %v789_v18 = vmax.f32 %v788_v2, %v2420_v11  ;;  %v798_v19 = vmax.f32 %v797_v3, %v2422_v14  ;;  %1988 = vpow2.f32 %v880_v52 }
  0xef   : > { %v2428_v20 = vpop.eup %1978  ;;  %1990 = vpow2.f32 %v882_v5 }
  0xf0   : > { %v2430_v22 = vpop.eup %1980  ;;  %1850 = vmatmul.msk.bf16.gmra.mxu0 %vm414_vm1, %v1904_v6  ;;  %1874 = vmatmul.msk.bf16.gmra.mxu1 %vm414_vm1, %v1904_v6  ;;  %v938_v23 = vadd.f32 %v2428_v20, %v2424_v16  ;;  %1992 = vrcp.f32 %v928_v8 }
  0xf1   : > { %v2436_v24 = vpop.eup %1982  ;;  %1994 = vrcp.f32 %v937_v15 }
  0xf2   : > { %v2438_v25 = vpop.eup %1984 }
  0xf3   : > { %v2440_v26 = vpop.eup %1986  ;;  %v947_v27 = vadd.f32 %v2438_v25, %v2436_v24 }
  0xf4   : > { %v2444_v28 = vpop.eup %1988 }
  0xf5   : > { %v2446_v29 = vpop.eup %1990  ;;  %v530_v30 = vpop.f32.mrf.mxu0  ;;  %v939_v32 = vadd.f32 %v2444_v28, %v938_v23 }
  0xf6   : > { %v2448_v31 = vpop.f32.mrf.mxu1  ;;  %v1993_v33 = vpop.eup %1992  ;;  %v790_v34 = vmax.f32 %v789_v18, %v530_v30  ;;  %v948_v40 = vadd.f32 %v2446_v29, %v947_v27 }
  0xf7   : > { %v799_v39 = vmax.f32 %v798_v19, %v2448_v31  ;;  %v1995_v41 = vpop.eup %1994  ;;  %v940_v42 = vadd.f32 %v2430_v22, %v939_v32  ;;  %v2455_v43 = vmul.f32 %v1993_v33, %v2382_v12  ;;  %v2458_v44 = vmul.f32 %v1993_v33, %v2387_v17 }
  0xf8   : > { %v2461_v45 = vmul.f32 %v1993_v33, %v2366_v4  ;;  %v791_v46 = vrot.slane %v790_v34, 4  ;;  %v949_v48 = vadd.f32 %v2440_v26, %v948_v40  ;;  %v2465_v49 = vmul.f32 %v1995_v41, %v2384_v13 }
  0xf9   : > { %3099 = vst [vmem:[#allocation5_spill] sm:$0xff] %v2455_v43  ;;  %v800_v47 = vrot.slane %v799_v39, 4  ;;  %v941_v50 = vrot.slane %v940_v42, 4  ;;  %v2470_v12 = vmul.f32 %v1995_v41, %v2390_v21  ;;  %v2473_v17 = vmul.f32 %v1993_v33, %v2370_v7  ;;  %v1905_v7 = vld [vmem:[%s3077_s1 + $0x70] sm:$0xff] }
  0xfa   : > { %3100 = vst [vmem:[#allocation6_spill] sm:$0xff] %v2458_v44  ;;  %v792_v54 = vmax.f32 %v790_v34, %v791_v46  ;;  %v950_v55 = vrot.slane %v949_v48, 4  ;;  %v2476_v56 = vmul.f32 %v1995_v41, %v2376_v9  ;;  %v2483_v61 = vmul.f32 %v1995_v41, %v2378_v10 }
  0xfb   : > { %3101 = vst [vmem:[#allocation7_spill] sm:$0xff] %v2461_v45  ;;  %v801_v4 = vmax.f32 %v799_v39, %v800_v47  ;;  %v942_v59 = vadd.f32 %v941_v50, %v940_v42 }
  0xfc   : > { %3102 = vst [vmem:[#allocation8_spill] sm:$0xff] %v2465_v49  ;;  %v793_v21 = vrot.slane %v792_v54, 2  ;;  %v951_v63 = vadd.f32 %v950_v55, %v949_v48  ;;  %v1906_v48 = vld [vmem:[%s3077_s1 + $0x78] sm:$0xff] }
  0xfd   : > { %3103 = vst [vmem:[#allocation9_spill] sm:$0xff] %v2470_v12  ;;  %v802_v62 = vrot.slane %v801_v4, 2  ;;  %v2488_v37 = vpop.f32.mrf.mxu0  ;;  %v943_v1 = vrot.slane %v942_v59, 2 }
  0xfe   : > { %3104 = vst [vmem:[#allocation10_spill] sm:$0xff] %v2473_v17  ;;  %v2490_v9 = vpop.f32.mrf.mxu1  ;;  %v794_v0 = vmax.f32 %v792_v54, %v793_v21  ;;  %v952_v52 = vrot.slane %v951_v63, 2 }
  0xff   : > { %3105 = vst [vmem:[#allocation11_spill] sm:$0xff] %v2476_v56  ;;  %v803_v38 = vmax.f32 %v801_v4, %v802_v62  ;;  %v944_v6 = vadd.f32 %v943_v1, %v942_v59 }
 0x100   : > { %3106 = vst [vmem:[#allocation12_spill] sm:$0xff] %v2483_v61  ;;  %v795_v10 = vrot.slane %v794_v0, 1  ;;  %1851 = vmatmul.msk.bf16.gmra.mxu0 %vm414_vm1, %v1905_v7  ;;  %1875 = vmatmul.msk.bf16.gmra.mxu1 %vm414_vm1, %v1905_v7  ;;  %v953_v8 = vadd.f32 %v952_v52, %v951_v63 }
 0x101   : > { %v804_v5 = vrot.slane %v803_v38, 1 }
 0x102   : > { %v796_v2 = vmax.f32 %v794_v0, %v795_v10 }
 0x103   : > { %v805_v3 = vmax.f32 %v803_v38, %v804_v5 }
 0x104   : > { %v840_v15 = vsub.f32 %v2397_v35, %v796_v2  ;;  %v842_v18 = vsub.f32 %v2407_v57, %v796_v2  ;;  %v846_v19 = vsub.f32 %v530_v30, %v796_v2  ;;  %v844_v39 = vsub.f32 %v2420_v11, %v796_v2 }
 0x105   : > { %v841_v23 = vsub.f32 %v2399_v36, %v805_v3  ;;  %v843_v27 = vsub.f32 %v2409_v58, %v805_v3  ;;  %v847_v32 = vsub.f32 %v2448_v31, %v805_v3  ;;  %v2501_v33 = vpop.f32.mrf.mxu0  ;;  %v845_v40 = vsub.f32 %v2422_v14, %v805_v3 }
 0x106   : > { %v2503_v34 = vpop.f32.mrf.mxu1  ;;  %v888_v41 = vmul.f32 1.442695, %v840_v15  ;;  %v892_v42 = vmul.f32 1.442695, %v842_v18  ;;  %v900_v35 = vmul.f32 1.442695, %v846_v19  ;;  %v806_v11 = vmax.f32 %v2488_v37, %v2501_v33 }
 0x107   : > { %v890_v46 = vmul.f32 1.442695, %v841_v23  ;;  %v894_v57 = vmul.f32 1.442695, %v843_v27  ;;  %v945_v30 = vrot.slane %v944_v6, 1  ;;  %v954_v58 = vrot.slane %v953_v8, 1 }
 0x108   : > { %1996 = vpow2.f32 %v888_v41  ;;  %v902_v36 = vmul.f32 1.442695, %v847_v32  ;;  %v896_v31 = vmul.f32 1.442695, %v844_v39  ;;  %v898_v47 = vmul.f32 1.442695, %v845_v40 }
 0x109   : > { %1998 = vpow2.f32 %v892_v42  ;;  %v815_v14 = vmax.f32 %v2490_v9, %v2503_v34  ;;  %v946_v50 = vadd.f32 %v945_v30, %v944_v6  ;;  %v955_v55 = vadd.f32 %v954_v58, %v953_v8 }
 0x10a   : > { %2000 = vpow2.f32 %v900_v35 }
 0x10b   : > { %2002 = vpow2.f32 %v890_v46 }
 0x10c   : > { %2004 = vpow2.f32 %v894_v57 }
 0x10d   : > { %2006 = vpow2.f32 %v902_v36  ;;  %v2514_v54 = vpop.f32.mrf.mxu0 }
 0x10e   : > { %v2516_v4 = vpop.f32.mrf.mxu1  ;;  %v2518_v59 = vpop.eup %1996  ;;  %v807_v21 = vmax.f32 %v806_v11, %v2514_v54  ;;  %2008 = vpow2.f32 %v896_v31 }
 0x10f   : > { %v816_v62 = vmax.f32 %v815_v14, %v2516_v4  ;;  %v2522_v7 = vpop.eup %1998  ;;  %2010 = vpow2.f32 %v898_v47 }
 0x110   : > { %v2524_v63 = vpop.eup %2000  ;;  %1852 = vmatmul.msk.bf16.gmra.mxu0 %vm414_vm1, %v1906_v48  ;;  %1876 = vmatmul.msk.bf16.gmra.mxu1 %vm414_vm1, %v1906_v48  ;;  %v956_v0 = vadd.f32 %v2522_v7, %v2518_v59  ;;  %2012 = vrcp.f32 %v946_v50 }
 0x111   : > { %v2530_v38 = vpop.eup %2002  ;;  %2014 = vrcp.f32 %v955_v55 }
 0x112   : > { %v2532_v1 = vpop.eup %2004 }
 0x113   : > { %v2534_v52 = vpop.eup %2006  ;;  %v965_v10 = vadd.f32 %v2532_v1, %v2530_v38 }
 0x114   : > { %v2538_v5 = vpop.eup %2008 }
 0x115   : > { %v2540_v2 = vpop.eup %2010  ;;  %v2542_v3 = vpop.f32.mrf.mxu0  ;;  %v957_v8 = vadd.f32 %v2538_v5, %v956_v0 }
 0x116   : > { %v2544_v6 = vpop.f32.mrf.mxu1  ;;  %v2013_v15 = vpop.eup %2012  ;;  %v808_v18 = vmax.f32 %v807_v21, %v2542_v3  ;;  %v966_v23 = vadd.f32 %v2540_v2, %v965_v10 }
 0x117   : > { %v817_v19 = vmax.f32 %v816_v62, %v2544_v6  ;;  %v2015_v27 = vpop.eup %2014  ;;  %v958_v32 = vadd.f32 %v2524_v63, %v957_v8  ;;  %v2552_v39 = vmul.f32 %v2013_v15, %v2444_v28  ;;  %v2555_v40 = vmul.f32 %v2013_v15, %v2430_v22 }
 0x118   : > { %v2558_v41 = vmul.f32 %v2013_v15, %v2424_v16  ;;  %v809_v42 = vrot.slane %v808_v18, 4  ;;  %v967_v46 = vadd.f32 %v2534_v52, %v966_v23  ;;  %v2562_v57 = vmul.f32 %v2015_v27, %v2446_v29 }
 0x119   : > { %3107 = vst [vmem:[#allocation13_spill] sm:$0xff] %v2552_v39  ;;  %v818_v35 = vrot.slane %v817_v19, 4  ;;  %v959_v30 = vrot.slane %v958_v32, 4  ;;  %v2567_v28 = vmul.f32 %v2015_v27, %v2440_v26  ;;  %v2570_v22 = vmul.f32 %v2013_v15, %v2428_v20 }
 0x11a   : > { %3108 = vst [vmem:[#allocation14_spill] sm:$0xff] %v2558_v41  ;;  %v810_v58 = vmax.f32 %v808_v18, %v809_v42  ;;  %v968_v31 = vrot.slane %v967_v46, 4  ;;  %v2573_v47 = vmul.f32 %v2015_v27, %v2436_v24  ;;  %v2580_v48 = vmul.f32 %v2015_v27, %v2438_v25 }
 0x11b   : > { %3109 = vst [vmem:[#allocation15_spill] sm:$0xff] %v2562_v57  ;;  %v819_v16 = vmax.f32 %v817_v19, %v818_v35  ;;  %v960_v11 = vadd.f32 %v959_v30, %v958_v32 }
 0x11c   : > { %3110 = vst [vmem:[#allocation16_spill] sm:$0xff] %v2567_v28  ;;  %v811_v26 = vrot.slane %v810_v58, 2  ;;  %v969_v20 = vadd.f32 %v968_v31, %v967_v46 }
 0x11d   : > { %3111 = vst [vmem:[#allocation17_spill] sm:$0xff] %v2570_v22  ;;  %v820_v50 = vrot.slane %v819_v16, 2  ;;  %v2582_v55 = vpop.f32.mrf.mxu0  ;;  %v961_v62 = vrot.slane %v960_v11, 2 }
 0x11e   : > { %3112 = vst [vmem:[#allocation18_spill] sm:$0xff] %v2573_v47  ;;  %v2584_v21 = vpop.f32.mrf.mxu1  ;;  %v812_v0 = vmax.f32 %v810_v58, %v811_v26  ;;  %v970_v19 = vrot.slane %v969_v20, 2 }
 0x11f   : > { %3113 = vst [vmem:[#allocation19_spill] sm:$0xff] %v2580_v48  ;;  %v821_v10 = vmax.f32 %v819_v16, %v820_v50  ;;  %v962_v8 = vadd.f32 %v961_v62, %v960_v11 }
 0x120   : > { %v813_v15 = vrot.slane %v812_v0, 1  ;;  %v971_v30 = vadd.f32 %v970_v19, %v969_v20 }
 0x121   : > { %v822_v18 = vrot.slane %v821_v10, 1  ;;  %v963_v23 = vrot.slane %v962_v8, 1 }
 0x122   : > { %v814_v25 = vmax.f32 %v812_v0, %v813_v15 }
 0x123   : > { %v823_v27 = vmax.f32 %v821_v10, %v822_v18  ;;  %v964_v32 = vadd.f32 %v963_v23, %v962_v8 }
 0x124   : > { %v848_v42 = vsub.f32 %v2488_v37, %v814_v25  ;;  %v850_v35 = vsub.f32 %v2501_v33, %v814_v25  ;;  %v854_v31 = vsub.f32 %v2542_v3, %v814_v25  ;;  %v852_v26 = vsub.f32 %v2514_v54, %v814_v25 }
 0x125   : > { %v849_v46 = vsub.f32 %v2490_v9, %v823_v27  ;;  %v851_v58 = vsub.f32 %v2503_v34, %v823_v27  ;;  %v2593_v16 = vpop.f32.mrf.mxu0  ;;  %v853_v50 = vsub.f32 %v2516_v4, %v823_v27  ;;  %2016 = vrcp.f32 %v964_v32 }
 0x126   : > { %v2595_v11 = vpop.f32.mrf.mxu1  ;;  %v904_v62 = vmul.f32 1.442695, %v848_v42  ;;  %v908_v0 = vmul.f32 1.442695, %v850_v35  ;;  %v972_v9 = vrot.slane %v971_v30, 1  ;;  %v855_v3 = vsub.f32 %v2544_v6, %v823_v27 }
 0x127   : > { %v906_v37 = vmul.f32 1.442695, %v849_v46  ;;  %v910_v33 = vmul.f32 1.442695, %v851_v58  ;;  %v916_v20 = vmul.f32 1.442695, %v854_v31 }
 0x128   : > { %2018 = vpow2.f32 %v904_v62  ;;  %v912_v34 = vmul.f32 1.442695, %v852_v26  ;;  %v914_v10 = vmul.f32 1.442695, %v853_v50  ;;  %v973_v8 = vadd.f32 %v972_v9, %v971_v30 }
 0x129   : > { %2020 = vpow2.f32 %v908_v0  ;;  %v918_v54 = vmul.f32 1.442695, %v855_v3 }
 0x12a   : > { %2022 = vpow2.f32 %v906_v37 }
 0x12b   : > { %2024 = vpow2.f32 %v910_v33  ;;  %v2017_v15 = vpop.eup %2016 }
 0x12c   : > { %2026 = vpow2.f32 %v916_v20  ;;  %v2605_v23 = vmul.f32 %v2017_v15, %v2538_v5  ;;  %v2608_v25 = vmul.f32 %v2017_v15, %v2524_v63  ;;  %v2611_v27 = vmul.f32 %v2017_v15, %v2518_v59 }
 0x12d   : > { %v2600_v4 = vpop.f32.mrf.mxu0  ;;  %2028 = vpow2.f32 %v912_v34  ;;  %v2614_v32 = vmul.f32 %v2017_v15, %v2522_v7 }
 0x12e   : > { %v2602_v18 = vpop.f32.mrf.mxu1  ;;  %v2019_v19 = vpop.eup %2018  ;;  %2030 = vpow2.f32 %v914_v10 }
 0x12f   : > { %v2021_v6 = vpop.eup %2020  ;;  %2032 = vrcp.f32 %v973_v8 }
 0x130   : > { %v974_v42 = vadd.f32 %v2021_v6, %v2019_v19  ;;  %v2023_v46 = vpop.eup %2022  ;;  %2034 = vpow2.f32 %v918_v54 }
 0x131   : > { %v2025_v63 = vpop.eup %2024 }
 0x132   : > { %v2027_v30 = vpop.eup %2026  ;;  %v983_v31 = vadd.f32 %v2025_v63, %v2023_v46 }
 0x133   : > { %v2029_v58 = vpop.eup %2028 }
 0x134   : > { %v2031_v26 = vpop.eup %2030  ;;  %v975_v7 = vadd.f32 %v2029_v58, %v974_v42 }
 0x135   : > { %v2620_v59 = vpop.f32.mrf.mxu0  ;;  %v2033_v62 = vpop.eup %2032  ;;  %v984_v0 = vadd.f32 %v2031_v26, %v983_v31 }
 0x136   : > { %v2622_v50 = vpop.f32.mrf.mxu1  ;;  %v2035_v37 = vpop.eup %2034  ;;  %v976_v33 = vadd.f32 %v2027_v30, %v975_v7  ;;  %v2625_v9 = vmul.f32 %v2033_v62, %v2540_v2  ;;  %v2628_v20 = vmul.f32 %v2033_v62, %v2534_v52  ;;  %v2631_v3 = vmul.f32 %v2033_v62, %v2530_v38 }
 0x137   : > { %v985_v34 = vadd.f32 %v2035_v37, %v984_v0  ;;  %v2634_v10 = vmul.f32 %v2033_v62, %v2532_v1 }
 0x138   : > { %v977_v8 = vrot.slane %v976_v33, 4 }
 0x139   : > { %v986_v54 = vrot.slane %v985_v34, 4 }
 0x13a   : > { %v978_v2 = vadd.f32 %v977_v8, %v976_v33 }
 0x13b   : > { %v987_v31 = vadd.f32 %v986_v54, %v985_v34 }
 0x13c   : > { %v979_v38 = vrot.slane %v978_v2, 2 }
 0x13d   : > { %v2640_v7 = vpop.f32.mrf.mxu0  ;;  %v988_v51 = vrot.slane %v987_v31, 2 }
 0x13e   : > { %v2642_v52 = vpop.f32.mrf.mxu1  ;;  %v980_v0 = vadd.f32 %v979_v38, %v978_v2 }
 0x13f   : > { %v989_v60 = vadd.f32 %v988_v51, %v987_v31 }
 0x140   : > { %v981_v1 = vrot.slane %v980_v0, 1 }
 0x141   : > { %v990_v62 = vrot.slane %v989_v60, 1 }
 0x142   : > { %v982_v13 = vadd.f32 %v981_v1, %v980_v0 }
 0x143   : > { %v991_v53 = vadd.f32 %v990_v62, %v989_v60 }
 0x144   : > { %2036 = vrcp.f32 %v982_v13 }
 0x145   : > { %v2644_v24 = vpop.f32.mrf.mxu0  ;;  %2038 = vrcp.f32 %v991_v53 }
 0x146   : > { %v2646_v14 = vpop.f32.mrf.mxu1 }
 0x14a   : > { %v2037_v33 = vpop.eup %2036 }
 0x14b   : > { %v2039_v34 = vpop.eup %2038  ;;  %v2648_v8 = vmul.f32 %v2037_v33, %v2029_v58  ;;  %v2650_v54 = vmul.f32 %v2037_v33, %v2027_v30  ;;  %v2652_v29 = vmul.f32 %v2037_v33, %v2019_v19  ;;  %v2654_v2 = vmul.f32 %v2037_v33, %v2021_v6 }
 0x14c   : > { %v2660_v60 = vmul.f32 %v2039_v34, %v2031_v26  ;;  %v2662_v38 = vmul.f32 %v2039_v34, %v2035_v37  ;;  %v2664_v13 = vmul.f32 %v2039_v34, %v2023_v46  ;;  %v2666_v53 = vmul.f32 %v2039_v34, %v2025_v63 }
 0x14d   : > { %v2656_v51 = vpop.f32.mrf.mxu0  ;;  %v1047_v30 = vmax.f32 %v2644_v24, %v2646_v14 }
 0x14e   : > { %v2658_v31 = vpop.f32.mrf.mxu1 }
 0x14f   : > { %v1050_v58 = vmax.f32 %v2656_v51, %v2658_v31 }
 0x155   : > { %v2676_v26 = vpop.f32.mrf.mxu0 }
 0x156   : > { %v2678_v37 = vpop.f32.mrf.mxu1 }
 0x15d   : > { %v2680_v46 = vpop.f32.mrf.mxu0 }
 0x15e   : > { %v2682_v63 = vpop.f32.mrf.mxu1 }
 0x165   : > { %v2684_v0 = vpop.f32.mrf.mxu0 }
 0x166   : > { %v2686_v1 = vpop.f32.mrf.mxu1 }
 0x167   : > { %v1059_v45 = vmax.f32 %v2684_v0, %v2686_v1 }
 0x16d   : > { %v2688_v62 = vpop.f32.mrf.mxu0 }
 0x16e   : > { %v2690_v33 = vpop.f32.mrf.mxu1 }
 0x16f   : > { %v1062_v34 = vmax.f32 %v2688_v62, %v2690_v33 }
 0x171   : > { %1063 = vmax.xlane.f32.xlu2 %v1062_v34 }
 0x175   : > { %v2694_v36 = vpop.f32.mrf.mxu0 }
 0x176   : > { %v2696_v42 = vpop.f32.mrf.mxu1 }
 0x177   : > { %v1065_v5 = vmax.f32 %v2694_v36, %v2696_v42 }
 0x179   : > { %1066 = vmax.xlane.f32.xlu2 %v1065_v5 }
 0x17d   : > { %v2700_v15 = vpop.f32.mrf.mxu0 }
 0x17e   : > { %v2702_v35 = vpop.f32.mrf.mxu1 }
 0x17f   : > { %v1068_v19 = vmax.f32 %v2700_v15, %v2702_v35 }
 0x181   : > { %1051 = vmax.xlane.f32.xlu2 %v1050_v58  ;;  %1069 = vmax.xlane.f32.xlu1 %v1068_v19  ;;  %v1044_v19 = vmax.f32 %v2640_v7, %v2642_v52 }
 0x185   : > { %v575_v34 = vpop.f32.mrf.mxu0 }
 0x186   : > { %v704_v6 = vpop.f32.mrf.mxu1 }
 0x187   : > { %v1071_v56 = vmax.f32 %v575_v34, %v704_v6 }
 0x189   : > { %1048 = vmax.xlane.f32.xlu2 %v1047_v30  ;;  %1072 = vmax.xlane.f32.xlu1 %v1071_v56  ;;  %v1041_v30 = vmax.f32 %v2620_v59, %v2622_v50  ;;  %v1056_v56 = vmax.f32 %v2680_v46, %v2682_v63 }
 0x18d   : > { %v578_v5 = vpop.f32.mrf.mxu0 }
 0x18e   : > { %v707_v61 = vpop.f32.mrf.mxu1 }
 0x18f   : > { %v1074_v17 = vmax.f32 %v578_v5, %v707_v61 }
 0x191   : > { %1060 = vmax.xlane.f32.xlu1 %v1059_v45  ;;  %1075 = vmax.xlane.f32.xlu0 %v1074_v17  ;;  %v1032_v45 = vmax.f32 %v2582_v55, %v2584_v21  ;;  %v1053_v17 = vmax.f32 %v2676_v26, %v2678_v37 }
 0x195   : > { %v580_v49 = vpop.f32.mrf.mxu0 }
 0x196   : > { %v709_v12 = vpop.f32.mrf.mxu1 }
 0x197   : > { %v1077_v58 = vmax.f32 %v580_v49, %v709_v12 }
 0x199   : > { %1045 = vmax.xlane.f32.xlu1 %v1044_v19  ;;  %1078 = vmax.xlane.f32.xlu0 %v1077_v58  ;;  %v1038_v19 = vmax.f32 %v2600_v4, %v2602_v18 }
 0x1a1   : > { %1042 = vmax.xlane.f32.xlu1 %v1041_v30  ;;  %1057 = vmax.xlane.f32.xlu0 %v1056_v56 }
 0x1a9   : > { %1033 = vmax.xlane.f32.xlu1 %v1032_v45  ;;  %1054 = vmax.xlane.f32.xlu0 %v1053_v17 }
 0x1b1   : > { %1039 = vmax.xlane.f32.xlu0 %v1038_v19 }
 0x1e4   : > { %v1064_v56 = vpop.xlane.xlu2 %1063 }
 0x1f4   : > { %v1070_v58 = vpop.xlane.xlu1 %1069 }
 0x1fc   : > { %v1073_v43 = vpop.xlane.xlu1 %1072 }
 0x1fd   : > { %v1106_v44 = vsub.f32 %v575_v34, %v1073_v43  ;;  %v1107_v47 = vsub.f32 %v704_v6, %v1073_v43 }
 0x1ff   : > { %v1164_v48 = vmul.f32 1.442695, %v1106_v44  ;;  %v1166_v41 = vmul.f32 1.442695, %v1107_v47 }
 0x201   : > { %2040 = vpow2.f32 %v1164_v48  ;;  %v1067_v48 = vpop.xlane.xlu2 %1066 }
 0x202   : > { %2042 = vpow2.f32 %v1166_v41  ;;  %v1100_v41 = vsub.f32 %v2688_v62, %v1064_v56 }
 0x204   : > { %v1076_v30 = vpop.xlane.xlu0 %1075 }
 0x205   : > { %v1108_v22 = vsub.f32 %v578_v5, %v1076_v30  ;;  %v1109_v57 = vsub.f32 %v707_v61, %v1076_v30  ;;  %v1101_v61 = vsub.f32 %v2690_v33, %v1064_v56  ;;  %v1152_v30 = vmul.f32 1.442695, %v1100_v41 }
 0x207   : > { %v1168_v28 = vmul.f32 1.442695, %v1108_v22  ;;  %v1170_v39 = vmul.f32 1.442695, %v1109_v57  ;;  %v2724_v45 = vpop.eup %2040  ;;  %v1061_v57 = vpop.xlane.xlu1 %1060 }
 0x208   : > { %v2726_v17 = vpop.eup %2042 }
 0x209   : > { %2044 = vpow2.f32 %v1168_v28  ;;  %v1215_v19 = vadd.f32 %v2726_v17, %v2724_v45  ;;  %v1104_v28 = vsub.f32 %v2700_v15, %v1070_v58  ;;  %v1102_v15 = vsub.f32 %v2694_v36, %v1067_v48  ;;  %v1052_v41 = vpop.xlane.xlu2 %1051 }
 0x20a   : > { %2046 = vpow2.f32 %v1170_v39  ;;  %v1105_v39 = vsub.f32 %v2702_v35, %v1070_v58  ;;  %v1103_v35 = vsub.f32 %v2696_v42, %v1067_v48  ;;  %v1035_v36 = vmax.f32 %v2593_v16, %v2595_v11 }
 0x20b   : > { %1216 = vadd.xlane.f32.xlu1 %v1215_v19  ;;  %v1160_v19 = vmul.f32 1.442695, %v1104_v28 }
 0x20c   : > { %v1079_v43 = vpop.xlane.xlu0 %1078  ;;  %v1158_v48 = vmul.f32 1.442695, %v1103_v35 }
 0x20d   : > { %v1110_v44 = vsub.f32 %v580_v49, %v1079_v43  ;;  %v1111_v47 = vsub.f32 %v709_v12, %v1079_v43  ;;  %v1154_v12 = vmul.f32 1.442695, %v1101_v61  ;;  %v1162_v43 = vmul.f32 1.442695, %v1105_v39 }
 0x20f   : > { %v1172_v6 = vmul.f32 1.442695, %v1110_v44  ;;  %v1174_v22 = vmul.f32 1.442695, %v1111_v47  ;;  %v2732_v34 = vpop.eup %2044 }
 0x210   : > { %v2735_v5 = vpop.eup %2046 }
 0x211   : > { %2048 = vpow2.f32 %v1172_v6  ;;  %v1218_v49 = vadd.f32 %v2735_v5, %v2732_v34  ;;  %v1098_v6 = vsub.f32 %v2684_v0, %v1061_v57  ;;  %v1092_v0 = vsub.f32 %v2656_v51, %v1052_v41 }
 0x212   : > { %2050 = vpow2.f32 %v1174_v22  ;;  %v1156_v22 = vmul.f32 1.442695, %v1102_v15 }
 0x213   : > { %1219 = vadd.xlane.f32.xlu2 %v1218_v49  ;;  %2052 = vpow2.f32 %v1152_v30  ;;  %v1148_v30 = vmul.f32 1.442695, %v1098_v6  ;;  %v1093_v49 = vsub.f32 %v2658_v31, %v1052_v41 }
 0x214   : > { %v1058_v62 = vpop.xlane.xlu0 %1057  ;;  %2054 = vpow2.f32 %v1154_v12 }
 0x215   : > { %v1096_v33 = vsub.f32 %v2680_v46, %v1058_v62  ;;  %v1097_v56 = vsub.f32 %v2682_v63, %v1058_v62  ;;  %2056 = vpow2.f32 %v1160_v19  ;;  %v1099_v46 = vsub.f32 %v2686_v1, %v1061_v57  ;;  %v1046_v63 = vpop.xlane.xlu1 %1045 }
 0x216   : > { %2058 = vpow2.f32 %v1162_v43  ;;  %v1089_v51 = vsub.f32 %v2642_v52, %v1046_v63  ;;  %v1138_v35 = vmul.f32 1.442695, %v1093_v49 }
 0x217   : > { %v1144_v44 = vmul.f32 1.442695, %v1096_v33  ;;  %v1146_v58 = vmul.f32 1.442695, %v1097_v56  ;;  %v2744_v47 = vpop.eup %2048  ;;  %v1150_v12 = vmul.f32 1.442695, %v1099_v46  ;;  %v1088_v33 = vsub.f32 %v2640_v7, %v1046_v63 }
 0x218   : > { %v2747_v61 = vpop.eup %2050  ;;  %v1130_v6 = vmul.f32 1.442695, %v1089_v51 }
 0x219   : > { %2060 = vpow2.f32 %v1144_v44  ;;  %v1221_v42 = vadd.f32 %v2747_v61, %v2744_v47  ;;  %v2754_v39 = vpop.eup %2052  ;;  %v1136_v44 = vmul.f32 1.442695, %v1092_v0  ;;  %v1128_v7 = vmul.f32 1.442695, %v1088_v33 }
 0x21a   : > { %2062 = vpow2.f32 %v1146_v58  ;;  %v2758_v57 = vpop.eup %2054  ;;  %v1049_v58 = vpop.xlane.xlu2 %1048 }
 0x21b   : > { %1036 = vmax.xlane.f32.xlu2 %v1035_v36  ;;  %1222 = vadd.xlane.f32.xlu0 %v1221_v42  ;;  %v2762_v19 = vpop.eup %2056  ;;  %2064 = vpow2.f32 %v1156_v22  ;;  %v1090_v0 = vsub.f32 %v2644_v24, %v1049_v58 }
 0x21c   : > { %v1055_v28 = vpop.xlane.xlu0 %1054  ;;  %v2765_v43 = vpop.eup %2058  ;;  %2066 = vpow2.f32 %v1158_v48 }
 0x21d   : > { %v1094_v1 = vsub.f32 %v2676_v26, %v1055_v28  ;;  %v1095_v62 = vsub.f32 %v2678_v37, %v1055_v28  ;;  %2068 = vpow2.f32 %v1148_v30  ;;  %v1206_v37 = vadd.f32 %v2758_v57, %v2754_v39  ;;  %v1043_v46 = vpop.xlane.xlu1 %1042 }
 0x21e   : > { %2070 = vpow2.f32 %v1150_v12  ;;  %v1212_v41 = vadd.f32 %v2765_v43, %v2762_v19  ;;  %v1091_v12 = vsub.f32 %v2646_v14, %v1049_v58  ;;  %v1087_v33 = vsub.f32 %v2622_v50, %v1043_v46 }
 0x21f   : > { %v1140_v56 = vmul.f32 1.442695, %v1094_v1  ;;  %v1142_v15 = vmul.f32 1.442695, %v1095_v62  ;;  %v2768_v26 = vpop.eup %2060  ;;  %v1132_v24 = vmul.f32 1.442695, %v1090_v0 }
 0x220   : > { %v2770_v31 = vpop.eup %2062  ;;  %v1126_v58 = vmul.f32 1.442695, %v1087_v33 }
 0x221   : > { %2072 = vpow2.f32 %v1140_v56  ;;  %v1200_v52 = vadd.f32 %v2770_v31, %v2768_v26  ;;  %v2778_v22 = vpop.eup %2064 }
 0x222   : > { %2074 = vpow2.f32 %v1142_v15  ;;  %v2782_v48 = vpop.eup %2066 }
 0x223   : > { %2076 = vpow2.f32 %v1136_v44  ;;  %1207 = vadd.xlane.f32.xlu2 %v1206_v37  ;;  %1213 = vadd.xlane.f32.xlu0 %v1212_v41  ;;  %v2784_v28 = vpop.eup %2068  ;;  %v1209_v14 = vadd.f32 %v2782_v48, %v2778_v22 }
 0x224   : > { %v1040_v63 = vpop.xlane.xlu0 %1039  ;;  %2078 = vpow2.f32 %v1138_v35  ;;  %1201 = vadd.xlane.f32.xlu1 %v1200_v52  ;;  %v2787_v49 = vpop.eup %2070 }
 0x225   : > { %v1084_v36 = vsub.f32 %v2600_v4, %v1040_v63  ;;  %v1085_v42 = vsub.f32 %v2602_v18, %v1040_v63  ;;  %2080 = vpow2.f32 %v1128_v7  ;;  %v1086_v4 = vsub.f32 %v2620_v59, %v1043_v46  ;;  %v1034_v7 = vpop.xlane.xlu1 %1033 }
 0x226   : > { %2082 = vpow2.f32 %v1130_v6  ;;  %v1203_v51 = vadd.f32 %v2787_v49, %v2784_v28  ;;  %v1134_v59 = vmul.f32 1.442695, %v1091_v12  ;;  %v1080_v6 = vsub.f32 %v2582_v55, %v1034_v7 }
 0x227   : > { %v1120_v30 = vmul.f32 1.442695, %v1084_v36  ;;  %v1122_v1 = vmul.f32 1.442695, %v1085_v42  ;;  %v2790_v62 = vpop.eup %2072  ;;  %v1124_v37 = vmul.f32 1.442695, %v1086_v4  ;;  %v1081_v46 = vsub.f32 %v2584_v21, %v1034_v7 }
 0x228   : > { %v2793_v18 = vpop.eup %2074 }
 0x229   : > { %2084 = vpow2.f32 %v1120_v30  ;;  %v2796_v56 = vpop.eup %2076  ;;  %v1197_v15 = vadd.f32 %v2793_v18, %v2790_v62  ;;  %v1112_v30 = vmul.f32 1.442695, %v1080_v6  ;;  %v1114_v55 = vmul.f32 1.442695, %v1081_v46 }
 0x22a   : > { %2086 = vpow2.f32 %v1122_v1  ;;  %v2804_v44 = vpop.eup %2078 }
 0x22b   : > { %v2806_v35 = vpop.eup %2080  ;;  %1204 = vadd.xlane.f32.xlu2 %v1203_v51  ;;  %1210 = vadd.xlane.f32.xlu0 %v1209_v14  ;;  %2088 = vpow2.f32 %v1132_v24  ;;  %v1194_v42 = vadd.f32 %v2804_v44, %v2796_v56 }
 0x22c   : > { %v2808_v50 = vpop.eup %2082  ;;  %1198 = vadd.xlane.f32.xlu1 %v1197_v15  ;;  %2090 = vpow2.f32 %v1134_v59  ;;  %v1907_v15 = vld [vmem:[%s3077_s1 + $0x80] sm:$0xff]  ;;  %v1908_v59 = vld [vmem:[%s3077_s1 + $0x88] sm:$0xff] }
 0x22d   : > { %2092 = vpow2.f32 %v1124_v37  ;;  %v1188_v36 = vadd.f32 %v2808_v50, %v2806_v35  ;;  %1853 = vmatmul.msk.bf16.gmra.mxu0 %vm414_vm1, %v1907_v15  ;;  %1877 = vmatmul.msk.bf16.gmra.mxu1 %vm414_vm1, %v1907_v15 }
 0x22e   : > { %2094 = vpow2.f32 %v1126_v58 }
 0x22f   : > { %v2810_v41 = vpop.eup %2084  ;;  %2096 = vpow2.f32 %v1112_v30 }
 0x230   : > { %v2812_v52 = vpop.eup %2086  ;;  %2098 = vpow2.f32 %v1114_v55 }
 0x231   : > { %v1182_v63 = vadd.f32 %v2812_v52, %v2810_v41  ;;  %v2822_v0 = vpop.eup %2088 }
 0x232   : > { %v2824_v1 = vpop.eup %2090 }
 0x233   : > { %1189 = vadd.xlane.f32.xlu2 %v1188_v36  ;;  %1195 = vadd.xlane.f32.xlu0 %v1194_v42  ;;  %v2826_v12 = vpop.eup %2092  ;;  %v1191_v33 = vadd.f32 %v2824_v1, %v2822_v0 }
 0x234   : > { %1183 = vadd.xlane.f32.xlu1 %v1182_v63  ;;  %v2828_v21 = vpop.eup %2094  ;;  %v1909_v63 = vld [vmem:[%s3077_s1 + $0x90] sm:$0xff] }
 0x235   : > { %v1185_v4 = vadd.f32 %v2828_v21, %v2826_v12  ;;  %v2834_v24 = vpop.eup %2096 }
 0x236   : > { %v2836_v51 = vpop.eup %2098 }
 0x237   : > { %v1176_v14 = vadd.f32 %v2836_v51, %v2834_v24 }
 0x23b   : > { %1186 = vadd.xlane.f32.xlu2 %v1185_v4  ;;  %1192 = vadd.xlane.f32.xlu0 %v1191_v33 }
 0x23d   : > { %1854 = vmatmul.msk.bf16.gmra.mxu0 %vm414_vm1, %v1908_v59  ;;  %1878 = vmatmul.msk.bf16.gmra.mxu1 %vm414_vm1, %v1908_v59 }
 0x243   : > { %1177 = vadd.xlane.f32.xlu0 %v1176_v14 }
 0x24d   : > { %1855 = vmatmul.msk.bf16.gmra.mxu0 %vm414_vm1, %v1909_v63  ;;  %1879 = vmatmul.msk.bf16.gmra.mxu1 %vm414_vm1, %v1909_v63 }
 0x27e   : > { %v1217_v55 = vpop.xlane.xlu1 %1216 }
 0x286   : > { %v1220_v37 = vpop.xlane.xlu2 %1219 }
 0x287   : > { %2100 = vrcp.f32 %v1220_v37 }
 0x28d   : > { %v2101_v30 = vpop.eup %2100 }
 0x28e   : > { %v1037_v58 = vpop.xlane.xlu2 %1036  ;;  %v1223_v7 = vpop.xlane.xlu0 %1222  ;;  %v1269_v14 = vmul.f32 %v2101_v30, %v2735_v5 }
 0x28f   : > { %v1082_v6 = vsub.f32 %v2593_v16, %v1037_v58  ;;  %v1083_v46 = vsub.f32 %v2595_v11, %v1037_v58  ;;  %2102 = vrcp.f32 %v1223_v7  ;;  %v1268_v16 = vmul.f32 %v2101_v30, %v2732_v34  ;;  %v1910_v30 = vld [vmem:[%s3077_s1 + $0x98] sm:$0xff] }
 0x290   : > { %1856 = vmatmul.msk.bf16.gmra.mxu0 %vm414_vm1, %v1910_v30  ;;  %1880 = vmatmul.msk.bf16.gmra.mxu1 %vm414_vm1, %v1910_v30 }
 0x291   : > { %v1116_v36 = vmul.f32 1.442695, %v1082_v6  ;;  %v1118_v42 = vmul.f32 1.442695, %v1083_v46 }
 0x293   : > { %2104 = vpow2.f32 %v1116_v36 }
 0x294   : > { %2106 = vpow2.f32 %v1118_v42 }
 0x295   : > { %v2103_v4 = vpop.eup %2102  ;;  %2108 = vrcp.f32 %v1217_v55 }
 0x296   : > { %v1214_v33 = vpop.xlane.xlu0 %1213  ;;  %v1270_v11 = vmul.f32 %v2103_v4, %v2744_v47  ;;  %v1271_v15 = vmul.f32 %v2103_v4, %v2747_v61  ;;  %v1208_v59 = vpop.xlane.xlu2 %1207 }
 0x297   : > { %2110 = vrcp.f32 %v1214_v33  ;;  %v1202_v55 = vpop.xlane.xlu1 %1201 }
 0x298   : > { %v1302_v37 = vpack.c.bf16 %v1270_v11, %v1268_v16  ;;  %v1303_v58 = vpack.c.bf16 %v1271_v15, %v1269_v14  ;;  %2112 = vrcp.f32 %v1208_v59 }
 0x299   : > { %v2861_v7 = vpop.eup %2104 }
 0x29a   : > { %v2863_v6 = vpop.eup %2106  ;;  %1320 = vmatpush.bf16.xpose.msra.mxu2 %v1302_v37  ;;  %1369 = vmatpush.bf16.xpose.msra.mxu3 %v1303_v58 }
 0x29b   : > { %v1179_v34 = vadd.f32 %v2863_v6, %v2861_v7  ;;  %v2109_v46 = vpop.eup %2108 }
 0x29c   : > { %v1266_v63 = vmul.f32 %v2109_v46, %v2724_v45  ;;  %v1267_v42 = vmul.f32 %v2109_v46, %v2726_v17 }
 0x29d   : > { %1180 = vadd.xlane.f32.xlu1 %v1179_v34  ;;  %v2111_v5 = vpop.eup %2110 }
 0x29e   : > { %v1211_v47 = vpop.xlane.xlu0 %1210  ;;  %v1264_v61 = vmul.f32 %v2111_v5, %v2762_v19  ;;  %v1265_v36 = vmul.f32 %v2111_v5, %v2765_v43  ;;  %v1205_v4 = vpop.xlane.xlu2 %1204 }
 0x29f   : > { %2114 = vrcp.f32 %v1211_v47  ;;  %v2113_v11 = vpop.eup %2112  ;;  %v1199_v34 = vpop.xlane.xlu1 %1198 }
 0x2a0   : > { %v1300_v33 = vpack.c.bf16 %v1266_v63, %v1264_v61  ;;  %v1301_v16 = vpack.c.bf16 %v1267_v42, %v1265_v36  ;;  %2116 = vrcp.f32 %v1205_v4  ;;  %v1260_v19 = vmul.f32 %v2113_v11, %v2754_v39 }
 0x2a1   : > { %2118 = vrcp.f32 %v1202_v55  ;;  %v1261_v14 = vmul.f32 %v2113_v11, %v2758_v57 }
 0x2a2   : > { %1321 = vmatpush.bf16.xpose.msra.mxu2 %v1300_v33  ;;  %1370 = vmatpush.bf16.xpose.msra.mxu3 %v1301_v16 }
 0x2a5   : > { %v2115_v45 = vpop.eup %2114 }
 0x2a6   : > { %v1196_v17 = vpop.xlane.xlu0 %1195  ;;  %v1262_v43 = vmul.f32 %v2115_v45, %v2778_v22  ;;  %v1263_v15 = vmul.f32 %v2115_v45, %v2782_v48  ;;  %v2117_v58 = vpop.eup %2116  ;;  %v1911_v48 = vld [vmem:[%s3077_s1 + $0xa0] sm:$0xff] }
 0x2a7   : > { %v2119_v46 = vpop.eup %2118  ;;  %2120 = vrcp.f32 %v1196_v17  ;;  %v1258_v47 = vmul.f32 %v2117_v58, %v2784_v28  ;;  %v1259_v5 = vmul.f32 %v2117_v58, %v2787_v49  ;;  %v1190_v39 = vpop.xlane.xlu2 %1189  ;;  %1857 = vmatmul.msk.bf16.gmra.mxu0 %vm414_vm1, %v1911_v48  ;;  %1881 = vmatmul.msk.bf16.gmra.mxu1 %vm414_vm1, %v1911_v48  ;;  %v1913_v58 = vld [vmem:[%s3077_s1 + $0xb0] sm:$0xff] }
 0x2a8   : > { %v1298_v59 = vpack.c.bf16 %v1262_v43, %v1260_v19  ;;  %v1299_v37 = vpack.c.bf16 %v1263_v15, %v1261_v14  ;;  %2122 = vrcp.f32 %v1199_v34  ;;  %v1256_v22 = vmul.f32 %v2119_v46, %v2768_v26  ;;  %v1184_v11 = vpop.xlane.xlu1 %1183 }
 0x2a9   : > { %v1257_v57 = vmul.f32 %v2119_v46, %v2770_v31 }
 0x2aa   : > { %1322 = vmatpush.bf16.xpose.msra.mxu2 %v1298_v59  ;;  %1371 = vmatpush.bf16.xpose.msra.mxu3 %v1299_v37  ;;  %v1296_v63 = vpack.c.bf16 %v1258_v47, %v1256_v22 }
 0x2ab   : > { %v1297_v36 = vpack.c.bf16 %v1259_v5, %v1257_v57 }
 0x2ad   : > { %v2121_v42 = vpop.eup %2120 }
 0x2ae   : > { %v1193_v61 = vpop.xlane.xlu0 %1192  ;;  %v2123_v30 = vpop.eup %2122  ;;  %v1252_v26 = vmul.f32 %v2121_v42, %v2796_v56  ;;  %v1253_v31 = vmul.f32 %v2121_v42, %v2804_v44 }
 0x2af   : > { %2124 = vrcp.f32 %v1193_v61  ;;  %v1254_v28 = vmul.f32 %v2123_v30, %v2790_v62  ;;  %v1255_v49 = vmul.f32 %v2123_v30, %v2793_v18  ;;  %v1187_v55 = vpop.xlane.xlu2 %1186  ;;  %v1912_v18 = vld [vmem:[%s3077_s1 + $0xa8] sm:$0xff] }
 0x2b0   : > { %2126 = vrcp.f32 %v1190_v39 }
 0x2b1   : > { %v1294_v4 = vpack.c.bf16 %v1254_v28, %v1252_v26  ;;  %v1295_v33 = vpack.c.bf16 %v1255_v49, %v1253_v31  ;;  %2128 = vrcp.f32 %v1187_v55  ;;  %v3114_v28 = vpack.c.bf16 %v2650_v54, %v2648_v8 }
 0x2b2   : > { %1323 = vmatpush.bf16.xpose.msra.mxu2 %v1296_v63  ;;  %1372 = vmatpush.bf16.xpose.msra.mxu3 %v1297_v36  ;;  %2130 = vrcp.f32 %v1184_v11  ;;  %v3115_v49 = vpack.c.bf16 %v2662_v38, %v2660_v60  ;;  %v3118_v8 = vpack.c.bf16 %v2608_v25, %v2605_v23  ;;  %v3119_v54 = vpack.c.bf16 %v2628_v20, %v2625_v9  ;;  %v3124_v23 = vld [vmem:[#allocation16_spill] sm:$0xff]  ;;  %v3125_v25 = vld [vmem:[#allocation15_spill] sm:$0xff]  ;;  %v3128_v11 = vld [vmem:[#allocation14_spill] sm:$0xff] }
 0x2b3   : > { %v3120_v60 = vpack.c.bf16 %v2614_v32, %v2611_v27  ;;  %v3130_v32 = vld [vmem:[#allocation19_spill] sm:$0xff] }
 0x2b5   : > { %v2125_v16 = vpop.eup %2124 }
 0x2b6   : > { %v2127_v45 = vpop.eup %2126  ;;  %v1250_v17 = vmul.f32 %v2125_v16, %v2822_v0  ;;  %v1251_v56 = vmul.f32 %v2125_v16, %v2824_v1  ;;  %v1178_v46 = vpop.xlane.xlu0 %1177  ;;  %v3127_v16 = vld [vmem:[#allocation17_spill] sm:$0xff] }
 0x2b7   : > { %v1248_v44 = vmul.f32 %v2127_v45, %v2806_v35  ;;  %v1249_v62 = vmul.f32 %v2127_v45, %v2808_v50  ;;  %v2129_v14 = vpop.eup %2128  ;;  %1858 = vmatmul.msk.bf16.gmra.mxu0 %vm414_vm1, %v1912_v18  ;;  %1882 = vmatmul.msk.bf16.gmra.mxu1 %vm414_vm1, %v1912_v18  ;;  %2132 = vrcp.f32 %v1178_v46  ;;  %v3129_v27 = vpack.c.bf16 %v3127_v16, %v3128_v11  ;;  %v3131_v45 = vld [vmem:[#allocation18_spill] sm:$0xff]  ;;  %v3137_v18 = vld [vmem:[#allocation8_spill] sm:$0xff]  ;;  %v275_v16 = vld [vmem:[%s3079_s3 + $0x10] sm:$0xff] }
 0x2b8   : > { %v2131_v15 = vpop.eup %2130  ;;  %v1246_v0 = vmul.f32 %v2129_v14, %v2826_v12  ;;  %v1247_v35 = vmul.f32 %v2129_v14, %v2828_v21  ;;  %v1914_v12 = vld [vmem:[%s3077_s1 + $0xb8] sm:$0xff]  ;;  %v3140_v14 = vld [vmem:[#allocation7_spill] sm:$0xff] }
 0x2b9   : > { %v1292_v19 = vpack.c.bf16 %v1250_v17, %v1248_v44  ;;  %v1293_v43 = vpack.c.bf16 %v1251_v56, %v1249_v62  ;;  %v1244_v50 = vmul.f32 %v2131_v15, %v2810_v41  ;;  %v1245_v1 = vmul.f32 %v2131_v15, %v2812_v52  ;;  %v712_v41 = vpop.f32.mrf.mxu1  ;;  %v583_v52 = vpop.f32.mrf.mxu0  ;;  %v3134_v56 = vld [vmem:[#allocation5_spill] sm:$0xff] }
 0x2ba   : > { %1324 = vmatpush.bf16.xpose.msra.mxu2 %v1294_v4  ;;  %1373 = vmatpush.bf16.xpose.msra.mxu3 %v1295_v33  ;;  %v3126_v33 = vpack.c.bf16 %v3124_v23, %v3125_v25  ;;  %v3136_v62 = vld [vmem:[#allocation9_spill] sm:$0xff] }
 0x2bb   : > { %v1290_v59 = vpack.c.bf16 %v1246_v0, %v1244_v50  ;;  %v1291_v37 = vpack.c.bf16 %v1247_v35, %v1245_v1  ;;  %v3142_v0 = vld [vmem:[#allocation12_spill] sm:$0xff]  ;;  %v3143_v35 = vld [vmem:[#allocation11_spill] sm:$0xff] }
 0x2bc   : > { %v3144_v50 = vpack.c.bf16 %v3142_v0, %v3143_v35 }
 0x2bd   : > { %v2133_v22 = vpop.eup %2132 }
 0x2be   : > { %v1240_v63 = vmul.f32 %v2133_v22, %v2834_v24  ;;  %v1241_v42 = vmul.f32 %v2133_v22, %v2836_v51  ;;  %v3116_v51 = vpack.c.bf16 %v2654_v2, %v2652_v29  ;;  %v3121_v29 = vpack.c.bf16 %v2634_v10, %v2631_v3 }
 0x2bf   : > { %v3132_v3 = vpack.c.bf16 %v3130_v32, %v3131_v45  ;;  %v276_v32 = vld [vmem:[%s3079_s3 + $0x18] sm:$0xff] }
 0x2c1   : > { %v585_v21 = vpop.f32.mrf.mxu0  ;;  %v714_v34 = vpop.f32.mrf.mxu1 }
 0x2c2   : > { %1325 = vmatpush.bf16.xpose.msra.mxu2 %v1292_v19  ;;  %1374 = vmatpush.bf16.xpose.msra.mxu3 %v1293_v43  ;;  %v1304_v4 = vpack.c.bf16 %v585_v21, %v583_v52  ;;  %v3138_v19 = vpack.c.bf16 %v3136_v62, %v3137_v18  ;;  %v3139_v43 = vld [vmem:[#allocation10_spill] sm:$0xff]  ;;  %v277_v62 = vld [vmem:[%s3079_s3 + $0x20] sm:$0xff] }
 0x2c3   : > { %v3141_v15 = vpack.c.bf16 %v3139_v43, %v3140_v14  ;;  %v278_v43 = vld [vmem:[%s3079_s3 + $0x28] sm:$0xff] }
 0x2c7   : > { %1859 = vmatmul.msk.bf16.gmra.mxu0 %vm414_vm1, %v1913_v58  ;;  %1883 = vmatmul.msk.bf16.gmra.mxu1 %vm414_vm1, %v1913_v58 }
 0x2c9   : > { %v588_v47 = vpop.f32.mrf.mxu0  ;;  %v717_v5 = vpop.f32.mrf.mxu1 }
 0x2ca   : > { %1326 = vmatpush.bf16.xpose.msra.mxu2 %v1290_v59  ;;  %1375 = vmatpush.bf16.xpose.msra.mxu3 %v1291_v37 }
 0x2d1   : > { %v590_v57 = vpop.f32.mrf.mxu0  ;;  %v719_v48 = vpop.f32.mrf.mxu1 }
 0x2d2   : > { %v1306_v9 = vpack.c.bf16 %v590_v57, %v588_v47  ;;  %v1307_v20 = vpack.c.bf16 %v719_v48, %v717_v5 }
 0x2d7   : > { %1860 = vmatmul.msk.bf16.gmra.mxu0 %vm414_vm1, %v1914_v12  ;;  %1884 = vmatmul.msk.bf16.gmra.mxu1 %vm414_vm1, %v1914_v12 }
 0x2d9   : > { %v593_v55 = vpop.f32.mrf.mxu0  ;;  %v722_v24 = vpop.f32.mrf.mxu1 }
 0x2e1   : > { %v595_v2 = vpop.f32.mrf.mxu0  ;;  %v724_v38 = vpop.f32.mrf.mxu1 }
 0x2e2   : > { %v1308_v37 = vpack.c.bf16 %v595_v2, %v593_v55  ;;  %v1309_v58 = vpack.c.bf16 %v724_v38, %v722_v24  ;;  %v274_v2 = vld [vmem:[%s3079_s3 + $0x8] sm:$0xff] }
 0x30d   : > { %v598_v10 = vpop.f32.mrf.mxu0  ;;  %v727_v17 = vpop.f32.mrf.mxu1 }
 0x310   : > { %v1181_v39 = vpop.xlane.xlu1 %1180 }
 0x311   : > { %2134 = vrcp.f32 %v1181_v39 }
 0x315   : > { %v600_v1 = vpop.f32.mrf.mxu0  ;;  %v729_v59 = vpop.f32.mrf.mxu1 }
 0x316   : > { %v1310_v52 = vpack.c.bf16 %v600_v1, %v598_v10  ;;  %v1311_v21 = vpack.c.bf16 %v729_v59, %v727_v17 }
 0x317   : > { %v2135_v61 = vpop.eup %2134 }
 0x318   : > { %v1242_v36 = vmul.f32 %v2135_v61, %v2861_v7  ;;  %v1243_v30 = vmul.f32 %v2135_v61, %v2863_v6  ;;  %v1305_v7 = vpack.c.bf16 %v714_v34, %v712_v41  ;;  %v3117_v6 = vpack.c.bf16 %v2666_v53, %v2664_v13  ;;  %v3122_v13 = vld [vmem:[#allocation13_spill] sm:$0xff] }
 0x319   : > { %v3123_v53 = vpack.c.bf16 %v2555_v40, %v3122_v13  ;;  %v3133_v40 = vld [vmem:[#allocation6_spill] sm:$0xff] }
 0x31a   : > { %v1288_v26 = vpack.c.bf16 %v1242_v36, %v1240_v63  ;;  %v1289_v31 = vpack.c.bf16 %v1243_v30, %v1241_v42  ;;  %v3135_v44 = vpack.c.bf16 %v3133_v40, %v3134_v56 }
 0x31c   : > { %1327 = vmatpush.bf16.xpose.msra.mxu2 %v1288_v26  ;;  %1376 = vmatpush.bf16.xpose.msra.mxu3 %v1289_v31 }
 0x323   : > { %1328 = vmatmul.bf16.vlgmr.msra.gmra.mxu2 %v1304_v4  ;;  %1377 = vmatmul.bf16.vlgmr.msra.gmra.mxu3 %v1305_v7 }
 0x324   : > { %1442 = vmatpush.bf16.msrb.mxu2 %v3114_v28  ;;  %1491 = vmatpush.bf16.msrb.mxu3 %v3115_v49  ;;  %v603_v12 = vpop.f32.mrf.mxu0  ;;  %v732_v41 = vpop.f32.mrf.mxu1 }
 0x328   : > { %1443 = vmatpush.bf16.msrb.mxu2 %v3116_v51  ;;  %1492 = vmatpush.bf16.msrb.mxu3 %v3117_v6 }
 0x32c   : > { %1444 = vmatpush.bf16.msrb.mxu2 %v3118_v8  ;;  %1493 = vmatpush.bf16.msrb.mxu3 %v3119_v54  ;;  %v605_v34 = vpop.f32.mrf.mxu0  ;;  %v734_v46 = vpop.f32.mrf.mxu1 }
 0x32d   : > { %v1312_v39 = vpack.c.bf16 %v605_v34, %v603_v12  ;;  %v1313_v22 = vpack.c.bf16 %v734_v46, %v732_v41  ;;  %v280_v41 = vld [vmem:[%s3079_s3 + $0x38] sm:$0xff] }
 0x330   : > { %1445 = vmatpush.bf16.msrb.mxu2 %v3120_v60  ;;  %1494 = vmatpush.bf16.msrb.mxu3 %v3121_v29  ;;  %v273_v60 = vld [vmem:[%s3079_s3] sm:$0xff] }
 0x333   : > { %1333 = vmatmul.bf16.gmra.mxu2 %v1306_v9  ;;  %1382 = vmatmul.bf16.gmra.mxu3 %v1307_v20 }
 0x334   : > { %1446 = vmatpush.bf16.msrb.mxu2 %v3123_v53  ;;  %1495 = vmatpush.bf16.msrb.mxu3 %v3126_v33  ;;  %v608_v47 = vpop.f32.mrf.mxu0  ;;  %v737_v5 = vpop.f32.mrf.mxu1 }
 0x338   : > { %1447 = vmatpush.bf16.msrb.mxu2 %v3129_v27  ;;  %1496 = vmatpush.bf16.msrb.mxu3 %v3132_v3 }
 0x33c   : > { %1448 = vmatpush.bf16.msrb.mxu2 %v3135_v44  ;;  %1497 = vmatpush.bf16.msrb.mxu3 %v3138_v19  ;;  %v610_v57 = vpop.f32.mrf.mxu0  ;;  %v739_v48 = vpop.f32.mrf.mxu1 }
 0x33d   : > { %v1314_v36 = vpack.c.bf16 %v610_v57, %v608_v47  ;;  %v1315_v42 = vpack.c.bf16 %v739_v48, %v737_v5  ;;  %v282_v48 = vld [vmem:[%s3079_s3 + $0x48] sm:$0xff] }
 0x340   : > { %1449 = vmatpush.bf16.msrb.mxu2 %v3141_v15  ;;  %1498 = vmatpush.bf16.msrb.mxu3 %v3144_v50 }
 0x343   : > { %1338 = vmatmul.bf16.gmra.mxu2 %v1308_v37  ;;  %1387 = vmatmul.bf16.gmra.mxu3 %v1309_v58  ;;  %v279_v37 = vld [vmem:[%s3079_s3 + $0x30] sm:$0xff] }
 0x344   : > { %v613_v61 = vpop.f32.mrf.mxu0  ;;  %v742_v63 = vpop.f32.mrf.mxu1 }
 0x34c   : > { %v615_v30 = vpop.f32.mrf.mxu0  ;;  %v744_v26 = vpop.f32.mrf.mxu1 }
 0x34d   : > { %v1316_v31 = vpack.c.bf16 %v615_v30, %v613_v61  ;;  %v1317_v28 = vpack.c.bf16 %v744_v26, %v742_v63 }
 0x353   : > { %1343 = vmatmul.bf16.gmra.mxu2 %v1310_v52  ;;  %1392 = vmatmul.bf16.gmra.mxu3 %v1311_v21 }
 0x354   : > { %v618_v49 = vpop.f32.mrf.mxu0  ;;  %v747_v55 = vpop.f32.mrf.mxu1 }
 0x35c   : > { %v620_v24 = vpop.f32.mrf.mxu0  ;;  %v749_v4 = vpop.f32.mrf.mxu1 }
 0x35d   : > { %v1318_v7 = vpack.c.bf16 %v620_v24, %v618_v49  ;;  %v1319_v51 = vpack.c.bf16 %v749_v4, %v747_v55  ;;  %v283_v49 = vld [vmem:[%s3079_s3 + $0x50] sm:$0xff]  ;;  %v284_v24 = vld [vmem:[%s3079_s3 + $0x58] sm:$0xff] }
 0x363   : > { %1348 = vmatmul.bf16.gmra.mxu2 %v1312_v39  ;;  %1397 = vmatmul.bf16.gmra.mxu3 %v1313_v22  ;;  %v281_v22 = vld [vmem:[%s3079_s3 + $0x40] sm:$0xff] }
 0x373   : > { %1353 = vmatmul.bf16.gmra.mxu2 %v1314_v36  ;;  %1402 = vmatmul.bf16.gmra.mxu3 %v1315_v42 }
 0x383   : > { %1358 = vmatmul.bf16.gmra.mxu2 %v1316_v31  ;;  %1407 = vmatmul.bf16.gmra.mxu3 %v1317_v28 }
 0x393   : > { %1363 = vmatmul.bf16.gmra.mxu2 %v1318_v7  ;;  %1412 = vmatmul.bf16.gmra.mxu3 %v1319_v51 }
 0x3a6   : > { %v1329_v6 = vpop.f32.mrf.mxu2  ;;  %v1378_v8 = vpop.f32.mrf.mxu3 }
 0x3a7   : > { %v1379_v54 = vadd.f32 %v1378_v8, %v1329_v6 }
 0x3a9   : > { %v1418_v53 = vmul.f32 %v1379_v54, %v273_v60 }
 0x3ae   : > { %v1331_v29 = vpop.f32.mrf.mxu2  ;;  %v1380_v38 = vpop.f32.mrf.mxu3 }
 0x3af   : > { %v1381_v13 = vadd.f32 %v1380_v38, %v1331_v29 }
 0x3b1   : > { %v1419_v23 = vmul.f32 %v1381_v13, %v274_v2  ;;  %v285_v2 = vld [vmem:[%s3079_s3 + $0x60] sm:$0xff]  ;;  %v286_v13 = vld [vmem:[%s3079_s3 + $0x68] sm:$0xff] }
 0x3b3   : > { %v1434_v25 = vpack.c.bf16 %v1419_v23, %v1418_v53 }
 0x3b5   : > { %1450 = vmatmul.bf16.vlgmr.msrb.gmra.mxu2 %v1434_v25  ;;  %1499 = vmatmul.bf16.vlgmr.msrb.gmra.mxu3 %v1434_v25 }
 0x3b6   : > { %v1334_v33 = vpop.f32.mrf.mxu2  ;;  %v1383_v9 = vpop.f32.mrf.mxu3 }
 0x3b7   : > { %v1384_v20 = vadd.f32 %v1383_v9, %v1334_v33 }
 0x3b9   : > { %v1420_v3 = vmul.f32 %v1384_v20, %v275_v16 }
 0x3be   : > { %v1336_v11 = vpop.f32.mrf.mxu2  ;;  %v1385_v27 = vpop.f32.mrf.mxu3 }
 0x3bf   : > { %v1386_v45 = vadd.f32 %v1385_v27, %v1336_v11  ;;  %v287_v27 = vld [vmem:[%s3079_s3 + $0x70] sm:$0xff] }
 0x3c1   : > { %v1421_v10 = vmul.f32 %v1386_v45, %v276_v32  ;;  %v288_v45 = vld [vmem:[%s3079_s3 + $0x78] sm:$0xff] }
 0x3c3   : > { %v1435_v17 = vpack.c.bf16 %v1421_v10, %v1420_v3 }
 0x3c5   : > { %1455 = vmatmul.bf16.gmra.mxu2 %v1435_v17  ;;  %1504 = vmatmul.bf16.gmra.mxu3 %v1435_v17 }
 0x3c6   : > { %v1339_v40 = vpop.f32.mrf.mxu2  ;;  %v1388_v56 = vpop.f32.mrf.mxu3 }
 0x3c7   : > { %v1389_v44 = vadd.f32 %v1388_v56, %v1339_v40 }
 0x3c9   : > { %v1422_v15 = vmul.f32 %v1389_v44, %v277_v62 }
 0x3ce   : > { %v1341_v18 = vpop.f32.mrf.mxu2  ;;  %v1390_v19 = vpop.f32.mrf.mxu3 }
 0x3cf   : > { %v1391_v14 = vadd.f32 %v1390_v19, %v1341_v18 }
 0x3d1   : > { %v1423_v0 = vmul.f32 %v1391_v14, %v278_v43 }
 0x3d3   : > { %v1436_v35 = vpack.c.bf16 %v1423_v0, %v1422_v15 }
 0x3d5   : > { %1460 = vmatmul.bf16.gmra.mxu2 %v1436_v35  ;;  %1509 = vmatmul.bf16.gmra.mxu3 %v1436_v35 }
 0x3d6   : > { %v1344_v50 = vpop.f32.mrf.mxu2  ;;  %v1393_v1 = vpop.f32.mrf.mxu3 }
 0x3d7   : > { %v1394_v59 = vadd.f32 %v1393_v1, %v1344_v50 }
 0x3d9   : > { %v1424_v21 = vmul.f32 %v1394_v59, %v279_v37 }
 0x3de   : > { %v1346_v58 = vpop.f32.mrf.mxu2  ;;  %v1395_v12 = vpop.f32.mrf.mxu3 }
 0x3df   : > { %v1396_v52 = vadd.f32 %v1395_v12, %v1346_v58 }
 0x3e1   : > { %v1425_v34 = vmul.f32 %v1396_v52, %v280_v41 }
 0x3e3   : > { %v1437_v46 = vpack.c.bf16 %v1425_v34, %v1424_v21 }
 0x3e5   : > { %1465 = vmatmul.bf16.gmra.mxu2 %v1437_v46  ;;  %1514 = vmatmul.bf16.gmra.mxu3 %v1437_v46 }
 0x3e6   : > { %v1349_v47 = vpop.f32.mrf.mxu2  ;;  %v1398_v5 = vpop.f32.mrf.mxu3 }
 0x3e7   : > { %v1399_v39 = vadd.f32 %v1398_v5, %v1349_v47 }
 0x3e9   : > { %v1426_v36 = vmul.f32 %v1399_v39, %v281_v22 }
 0x3ee   : > { %v1351_v57 = vpop.f32.mrf.mxu2  ;;  %v1400_v61 = vpop.f32.mrf.mxu3 }
 0x3ef   : > { %v1401_v63 = vadd.f32 %v1400_v61, %v1351_v57 }
 0x3f1   : > { %v1427_v42 = vmul.f32 %v1401_v63, %v282_v48 }
 0x3f3   : > { %v1438_v30 = vpack.c.bf16 %v1427_v42, %v1426_v36 }
 0x3f5   : > { %1470 = vmatmul.bf16.gmra.mxu2 %v1438_v30  ;;  %1519 = vmatmul.bf16.gmra.mxu3 %v1438_v30 }
 0x3f6   : > { %v1354_v26 = vpop.f32.mrf.mxu2  ;;  %v1403_v31 = vpop.f32.mrf.mxu3 }
 0x3f7   : > { %v1404_v28 = vadd.f32 %v1403_v31, %v1354_v26 }
 0x3f9   : > { %v1428_v51 = vmul.f32 %v1404_v28, %v283_v49 }
 0x3fe   : > { %v1356_v55 = vpop.f32.mrf.mxu2  ;;  %v1405_v4 = vpop.f32.mrf.mxu3 }
 0x3ff   : > { %v1406_v7 = vadd.f32 %v1405_v4, %v1356_v55 }
 0x401   : > { %v1429_v6 = vmul.f32 %v1406_v7, %v284_v24 }
 0x403   : > { %v1439_v8 = vpack.c.bf16 %v1429_v6, %v1428_v51 }
 0x405   : > { %1475 = vmatmul.bf16.gmra.mxu2 %v1439_v8  ;;  %1524 = vmatmul.bf16.gmra.mxu3 %v1439_v8 }
 0x406   : > { %v1359_v54 = vpop.f32.mrf.mxu2  ;;  %v1408_v60 = vpop.f32.mrf.mxu3 }
 0x407   : > { %v1409_v29 = vadd.f32 %v1408_v60, %v1359_v54  ;;  %v289_v54 = vld [vmem:[%s3080_s4] sm:$0xff]  ;;  %v2206_v60 = vmov 0  }
 0x408   : > { %1958 = vset.pattern.permute.xlu2 %v2206_v60 }
 0x409   : > { %v1430_v25 = vmul.f32 %v1409_v29, %v285_v2  ;;  %v2207_v29 = vmov 1   ;;  %1558 = vperm.xlu2 %1958, %v289_v54  }
 0x40a   : > { %1959 = vset.pattern.permute.xlu0 %v2207_v29 }
 0x40b   : > { %1651 = vperm.xlu0 %1959, %v289_v54  }
 0x40e   : > { %v1361_v38 = vpop.f32.mrf.mxu2  ;;  %v1410_v53 = vpop.f32.mrf.mxu3 }
 0x40f   : > { %v1411_v23 = vadd.f32 %v1410_v53, %v1361_v38 }
 0x411   : > { %v1431_v33 = vmul.f32 %v1411_v23, %v286_v13 }
 0x413   : > { %v1440_v9 = vpack.c.bf16 %v1431_v33, %v1430_v25  ;;  %v272_v33 = vld [vmem:[%s3078_s2] sm:$0xf] }
 0x415   : > { %1480 = vmatmul.bf16.gmra.mxu2 %v1440_v9  ;;  %1529 = vmatmul.bf16.gmra.mxu3 %v1440_v9  ;;  %v2208_v9 = vmov 8.0  }
 0x416   : > { %v1364_v20 = vpop.f32.mrf.mxu2  ;;  %v1413_v16 = vpop.f32.mrf.mxu3  ;;  %2136 = vrcp.f32 %v2208_v9 }
 0x417   : > { %v1414_v11 = vadd.f32 %v1413_v16, %v1364_v20 }
 0x419   : > { %v1432_v17 = vmul.f32 %v1414_v11, %v287_v27 }
 0x41c   : > { %v2137_v20 = vpop.eup %2136 }
 0x41d   : > { %v1600_v16 = vmul.f32 8.0, %v2137_v20  ;;  %vm1604_vm2 = vweird.f32 %v2137_v20 }
 0x41e   : > { %v1366_v32 = vpop.f32.mrf.mxu2  ;;  %v1415_v3 = vpop.f32.mrf.mxu3 }
 0x41f   : > { %v1416_v10 = vadd.f32 %v1415_v3, %v1366_v32 }
 0x421   : > { %v1433_v40 = vmul.f32 %v1416_v10, %v288_v45  ;;  %v1601_v45 = vsub.f32 1.0, %v1600_v16 }
 0x423   : > { %v1441_v56 = vpack.c.bf16 %v1433_v40, %v1432_v17 }
 0x425   : > { %1485 = vmatmul.bf16.gmra.mxu2 %v1441_v56  ;;  %1534 = vmatmul.bf16.gmra.mxu3 %v1441_v56  ;;  %v1602_v56 = vmul.f32 %v2137_v20, %v1601_v45 }
 0x438   : > { %v3016_v44 = vpop.f32.mrf.mxu2  ;;  %v3018_v62 = vpop.f32.mrf.mxu3 }
 0x440   : > { %v3020_v18 = vpop.f32.mrf.mxu2  ;;  %v3022_v19 = vpop.f32.mrf.mxu3 }
 0x441   : > { %v1540_v43 = vpack.c.bf16 %v3020_v18, %v3016_v44  ;;  %v1541_v14 = vpack.c.bf16 %v3022_v19, %v3018_v62 }
 0x448   : > { %v1456_v15 = vpop.f32.mrf.mxu2  ;;  %v1505_v0 = vpop.f32.mrf.mxu3 }
 0x450   : > { %v1458_v35 = vpop.f32.mrf.mxu2  ;;  %v1507_v50 = vpop.f32.mrf.mxu3 }
 0x451   : > { %v1542_v1 = vpack.c.bf16 %v1458_v35, %v1456_v15  ;;  %v1543_v59 = vpack.c.bf16 %v1507_v50, %v1505_v0  ;;  %v1603_v15 = vadd.f32 %v2137_v20, %v1602_v56 }
 0x458   : > { %v1461_v37 = vpop.f32.mrf.mxu2  ;;  %v1510_v58 = vpop.f32.mrf.mxu3 }
 0x460   : > { %v1463_v12 = vpop.f32.mrf.mxu2  ;;  %v1512_v41 = vpop.f32.mrf.mxu3 }
 0x461   : > { %v1544_v52 = vpack.c.bf16 %v1463_v12, %v1461_v37  ;;  %v1545_v21 = vpack.c.bf16 %v1512_v41, %v1510_v58 }
 0x463   : > { %v1559_v11 = vpop.permute.xlu2 %1558 }
 0x468   : > { %v1466_v34 = vpop.f32.mrf.mxu2  ;;  %v1515_v46 = vpop.f32.mrf.mxu3 }
 0x470   : > { %v1468_v47 = vpop.f32.mrf.mxu2  ;;  %v1517_v5 = vpop.f32.mrf.mxu3 }
 0x471   : > { %v1546_v39 = vpack.c.bf16 %v1468_v47, %v1466_v34  ;;  %v1547_v22 = vpack.c.bf16 %v1517_v5, %v1515_v46 }
 0x478   : > { %v1471_v57 = vpop.f32.mrf.mxu2  ;;  %v1520_v48 = vpop.f32.mrf.mxu3 }
 0x480   : > { %v1473_v61 = vpop.f32.mrf.mxu2  ;;  %v1522_v63 = vpop.f32.mrf.mxu3 }
 0x481   : > { %v1548_v23 = vpack.c.bf16 %v1473_v61, %v1471_v57  ;;  %v1549_v25 = vpack.c.bf16 %v1522_v63, %v1520_v48 }
 0x488   : > { %v1476_v36 = vpop.f32.mrf.mxu2  ;;  %v1525_v42 = vpop.f32.mrf.mxu3 }
 0x490   : > { %v1478_v30 = vpop.f32.mrf.mxu2  ;;  %v1527_v26 = vpop.f32.mrf.mxu3 }
 0x491   : > { %v1550_v13 = vpack.c.bf16 %v1478_v30, %v1476_v36  ;;  %v1551_v53 = vpack.c.bf16 %v1527_v26, %v1525_v42 }
 0x498   : > { %v1481_v31 = vpop.f32.mrf.mxu2  ;;  %v1530_v28 = vpop.f32.mrf.mxu3 }
 0x4a0   : > { %v1483_v49 = vpop.f32.mrf.mxu2  ;;  %v1532_v55 = vpop.f32.mrf.mxu3 }
 0x4a1   : > { %v1552_v2 = vpack.c.bf16 %v1483_v49, %v1481_v31  ;;  %v1553_v38 = vpack.c.bf16 %v1532_v55, %v1530_v28 }
 0x4a8   : > { %v1486_v24 = vpop.f32.mrf.mxu2  ;;  %v1535_v4 = vpop.f32.mrf.mxu3 }
 0x4b0   : > { %v1488_v7 = vpop.f32.mrf.mxu2  ;;  %v1537_v51 = vpop.f32.mrf.mxu3 }
 0x4b1   : > { %v1554_v6 = vpack.c.bf16 %v1488_v7, %v1486_v24  ;;  %v1555_v8 = vpack.c.bf16 %v1537_v51, %v1535_v4 }
 0x4b3   : > { %1561 = vmatpush.bf16.msra.mxu2 %v1554_v6  ;;  %1574 = vmatpush.bf16.msra.mxu3 %v1555_v8 }
 0x4b7   : > { %1562 = vmatpush.bf16.msra.mxu2 %v1552_v2  ;;  %1575 = vmatpush.bf16.msra.mxu3 %v1553_v38 }
 0x4bb   : > { %1563 = vmatpush.bf16.msra.mxu2 %v1550_v13  ;;  %1576 = vmatpush.bf16.msra.mxu3 %v1551_v53  ;;  %v1652_v53 = vpop.permute.xlu0 %1651 }
 0x4bf   : > { %1564 = vmatpush.bf16.msra.mxu2 %v1548_v23  ;;  %1577 = vmatpush.bf16.msra.mxu3 %v1549_v25 }
 0x4c3   : > { %1565 = vmatpush.bf16.msra.mxu2 %v1546_v39  ;;  %1578 = vmatpush.bf16.msra.mxu3 %v1547_v22 }
 0x4c7   : > { %1566 = vmatpush.bf16.msra.mxu2 %v1544_v52  ;;  %1579 = vmatpush.bf16.msra.mxu3 %v1545_v21 }
 0x4cb   : > { %1567 = vmatpush.bf16.msra.mxu2 %v1542_v1  ;;  %1580 = vmatpush.bf16.msra.mxu3 %v1543_v59  ;;  %v1605_v59 = vsel %vm1604_vm2, %v2137_v20, %v1603_v15 }
 0x4cf   : > { %1568 = vmatpush.bf16.msra.mxu2 %v1540_v43  ;;  %1581 = vmatpush.bf16.msra.mxu3 %v1541_v14 }
 0x4d2   : > { %1569 = vmatmul.bf16.vlgmr.msra.gmra.mxu2 %v272_v33  ;;  %1582 = vmatmul.bf16.vlgmr.msra.gmra.mxu3 %v272_v33 }
 0x555   : > { %v1570_v27 = vpop.f32.mrf.mxu2  ;;  %v1583_v32 = vpop.f32.mrf.mxu3 }
 0x556   : > { %v1571_v3 = vadd.f32 %v1570_v27, %v1559_v11  ;;  %v1584_v10 = vadd.f32 %v1583_v32, %v1559_v11 }
 0x558   : > { %v1587_v17 = vrot.slane %v1571_v3, 4  ;;  %v1593_v40 = vrot.slane %v1584_v10, 4 }
 0x55a   : > { %v1588_v44 = vadd.f32 %v1587_v17, %v1571_v3  ;;  %v1594_v62 = vadd.f32 %v1593_v40, %v1584_v10 }
 0x55c   : > { %v1589_v18 = vrot.slane %v1588_v44, 2  ;;  %v1595_v19 = vrot.slane %v1594_v62, 2 }
 0x55d   : > { %v1572_v43 = vpop.f32.mrf.mxu2  ;;  %v1585_v14 = vpop.f32.mrf.mxu3 }
 0x55e   : > { %v1590_v0 = vadd.f32 %v1589_v18, %v1588_v44  ;;  %v1596_v35 = vadd.f32 %v1595_v19, %v1594_v62 }
 0x560   : > { %v1591_v50 = vrot.slane %v1590_v0, 1  ;;  %v1597_v1 = vrot.slane %v1596_v35, 1 }
 0x562   : > { %v1592_v37 = vadd.f32 %v1591_v50, %v1590_v0  ;;  %v1598_v58 = vadd.f32 %v1597_v1, %v1596_v35 }
 0x564   : > { %v1606_v12 = vmul.f32 %v1605_v59, %v1592_v37  ;;  %v1607_v41 = vmul.f32 %v1605_v59, %v1598_v58 }
 0x566   : > { %v1608_v52 = vsub.f32 %v1571_v3, %v1606_v12  ;;  %v1609_v21 = vsub.f32 %v1584_v10, %v1607_v41 }
 0x568   : > { %v1610_v34 = vmul.f32 %v1608_v52, %v1608_v52  ;;  %v1611_v46 = vmul.f32 %v1609_v21, %v1609_v21 }
 0x56a   : > { %v1612_v47 = vrot.slane %v1610_v34, 4  ;;  %v1618_v5 = vrot.slane %v1611_v46, 4 }
 0x56c   : > { %v1613_v39 = vadd.f32 %v1612_v47, %v1610_v34  ;;  %v1619_v22 = vadd.f32 %v1618_v5, %v1611_v46 }
 0x56e   : > { %v1614_v57 = vrot.slane %v1613_v39, 2  ;;  %v1620_v48 = vrot.slane %v1619_v22, 2 }
 0x570   : > { %v1615_v61 = vadd.f32 %v1614_v57, %v1613_v39  ;;  %v1621_v63 = vadd.f32 %v1620_v48, %v1619_v22 }
 0x572   : > { %v1616_v36 = vrot.slane %v1615_v61, 1  ;;  %v1622_v42 = vrot.slane %v1621_v63, 1 }
 0x574   : > { %v1617_v30 = vadd.f32 %v1616_v36, %v1615_v61  ;;  %v1623_v26 = vadd.f32 %v1622_v42, %v1621_v63 }
 0x576   : > { %v1624_v31 = vmul.f32 %v1617_v30, %v1605_v59  ;;  %v1625_v28 = vmul.f32 %v1623_v26, %v1605_v59 }
 0x578   : > { %v1626_v49 = vadd.f32 1e-05, %v1624_v31  ;;  %v1627_v55 = vadd.f32 1e-05, %v1625_v28 }
 0x57a   : > { %2138 = vrsqrt.f32 %v1626_v49  ;;  %vm1634_vm5 = vweird.f32 %v1626_v49  ;;  %vm1644_vm7 = vweird.f32 %v1627_v55 }
 0x57b   : > { %2140 = vrsqrt.f32 %v1627_v55 }
 0x580   : > { %v2139_v24 = vpop.eup %2138 }
 0x581   : > { %v2141_v4 = vpop.eup %2140  ;;  %v1629_v7 = vmul.f32 %v2139_v24, %v1626_v49  ;;  %vm1635_vm3 = vweird.f32 %v2139_v24 }
 0x582   : > { %v1639_v51 = vmul.f32 %v2141_v4, %v1627_v55  ;;  %vm1645_vm4 = vweird.f32 %v2141_v4  ;;  %vm1636_vm6 = vmor %vm1634_vm5, %vm1635_vm3 }
 0x583   : > { %v1630_v6 = vmul.f32 %v2139_v24, %v1629_v7  ;;  %vm1646_vm8 = vmor %vm1644_vm7, %vm1645_vm4 }
 0x584   : > { %v1640_v8 = vmul.f32 %v2141_v4, %v1639_v51 }
 0x585   : > { %v1631_v54 = vmul.f32 0.5, %v1630_v6 }
 0x586   : > { %v1641_v60 = vmul.f32 0.5, %v1640_v8 }
 0x587   : > { %v1632_v29 = vsub.f32 1.5, %v1631_v54 }
 0x588   : > { %v1642_v2 = vsub.f32 1.5, %v1641_v60 }
 0x589   : > { %v1633_v38 = vmul.f32 %v2139_v24, %v1632_v29 }
 0x58a   : > { %v1643_v13 = vmul.f32 %v2141_v4, %v1642_v2 }
 0x58b   : > { %v1637_v23 = vsel %vm1636_vm6, %v2139_v24, %v1633_v38 }
 0x58c   : > { %v1647_v25 = vsel %vm1646_vm8, %v2141_v4, %v1643_v13  ;;  %v1648_v33 = vmul.f32 %v1637_v23, %v1608_v52 }
 0x58d   : > { %v1649_v9 = vmul.f32 %v1647_v25, %v1609_v21 }
 0x58e   : > { %v1654_v20 = vmul.f32 %v1652_v53, %v1648_v33 }
 0x58f   : > { %v1655_v16 = vmul.f32 %v1652_v53, %v1649_v9 }
 0x590   : > { %1656 = vst [vmem:[%s217_s22] sm:$0xff] %v1654_v20 }
 0x591   : > { %1657 = vst [vmem:[%s217_s22 + $0x8] sm:$0xff] %v1655_v16 }
 0x592   : > { %2169 = shalt.err (!%p2166_p3)
}
 0x593   : > { %1916 = dma.vmem_to_hbm [thread:$0]  (%p2277_p5), %s1673_s26, 256, %s1675_s30, %s1659_s6  }
 0x594 PF: > { %p1922_p4 = scmp.ge.s32.totalorder %s2204_s21, 2  ;;  %s1686_s14 = sand.u32 1, %s2192_s18  }
 0x595   : > { %s1687_s15 = scalar_lea.sflag [#allocation3], %s1686_s14 }
 0x596   : > { %p1919_p7 = pnand %p1922_p4, %p2281_p6 }
 0x598   : > { %p1920_p8 = pneg %p1919_p7 }
 0x59a   : > { %2187 = dma.done.wait (%p1920_p8), %s1687_s15, 256  }
 0x59b   : > { %2189 = vsyncadd (%p1920_p8), %s1687_s15, 4294967040  ;;  %p15_p9 = scmp.ge.s32.totalorder %s2264_s24, 6   ;;  %s3145_s18 = smov %s2196_s19 }
 0x59c   : > { %s3146_s19 = smov %s2200_s20  ;;  %s3147_s20 = smov %s2275_s27 }
 0x59d   : > { %s3148_s21 = smov %s2264_s24  ;;  %17 = sbr.rel (!%p15_p9) target bundleno = 3 (0x3), region = 75 }
 0x5a2   :  { %1693 = vsyncpa [#allocation3], 1 }
 0x5a3   :  { %1695 = vsyncpa [#allocation3 + $0x1], 1 }

</bundles_post_ra>
